<compile_context>
chip_gen: v5e
topology: v5e:2x2
jax: 0.10.0
libtpu: 0.0.40
codegen_flags: <defaults>
</compile_context>

<pallas_src>
import jax
import jax.numpy as jnp
from jax.experimental import pallas as pl
from jax.experimental.pallas import tpu as pltpu

IM_SIZE = 28                      # MNIST-style images, as implied by the torch module
IN_DIM = IM_SIZE * IM_SIZE        # 784  (divisible by 8 -> valid sublane dim)
HIDDEN = 512
NUM_CLASSES = 10
OUT_PAD = 128                     # lane-dense classifier head (sliced back to 10)


def _round_up(x, m):
    return (x + m - 1) // m * m


def _choose_batch_tile(B):
    """Batch tile: small B -> one tile; moderate B -> >=2 tiles (v7x megacore);
    large B -> big tiles to amortize per-grid-step overhead."""
    if B <= 128:
        return _round_up(B, 8)
    if B <= 512:
        return 128
    if B <= 2048:
        return 256
    if B <= 8192:
        return 512
    return 1024


def mlp_kernel(x_ref, w1_ref, b1_ref, w2_ref, b2_ref, w3_ref, b3_ref, o_ref):
    # cast activations to bf16 in-kernel (no extra wrapper HBM pass)
    x = x_ref[...].astype(jnp.bfloat16)
    # block1: Linear + ReLU  (bf16 MXU matmul, f32 accumulate, f32 bias/ReLU)
    h1 = jnp.dot(x, w1_ref[...], preferred_element_type=jnp.float32)
    h1 = jnp.maximum(h1 + b1_ref[...], 0.0)
    # block2: Linear + ReLU
    h2 = jnp.dot(h1.astype(jnp.bfloat16), w2_ref[...],
                 preferred_element_type=jnp.float32)
    h2 = jnp.maximum(h2 + b2_ref[...], 0.0)
    # classifier head (lane-padded to 128 wide, no activation), bf16 writeback
    o = jnp.dot(h2.astype(jnp.bfloat16), w3_ref[...],
                preferred_element_type=jnp.float32)
    o_ref[...] = (o + b3_ref[...]).astype(o_ref.dtype)


def mynn_forward(x_img, packed_params):
    """x_img: [B, 1, IM_SIZE, IM_SIZE] float32 (NCHW). Returns logits [B, 10] f32."""
    w1, b1, w2, b2, w3, b3 = packed_params     # bf16 weights, f32 biases
    B = x_img.shape[0]

    # nn.Flatten only (metadata reshape); input stays f32 and unpadded along K.
    x = x_img.reshape(B, IN_DIM)

    TB = _choose_batch_tile(B)
    B_pad = _round_up(B, TB)
    if B_pad != B:
        # only touches the input when B isn't a tile multiple
        # TODO(synk): rely on Pallas masked tail-block stores (grid=pl.cdiv) once
        # verified on the target jax version to drop this pad entirely.
        x = jnp.pad(x, ((0, B_pad - B), (0, 0)))

    grid = (B_pad // TB,)

    flops = 2 * B_pad * (IN_DIM * HIDDEN + HIDDEN * HIDDEN + HIDDEN * OUT_PAD)
    bytes_accessed = (x.size * 4                                   # f32 input
                      + (w1.size + w2.size + w3.size) * 2          # bf16 weights
                      + (b1.size + b2.size + b3.size) * 4          # f32 biases
                      + B_pad * OUT_PAD * 2)                       # bf16 output

    # TODO(synk): for tiny serving batches (B <= 64) the ~1.4 MiB weight fetch
    # dominates; pre-stage weights across calls (P10 cross-pallas_call prefetch).

    out = pl.pallas_call(
        mlp_kernel,
        out_shape=jax.ShapeDtypeStruct((B_pad, OUT_PAD), jnp.bfloat16),
        grid_spec=pltpu.PrefetchScalarGridSpec(
            num_scalar_prefetch=0,
            grid=grid,
            in_specs=[
                # activations: tiled over batch (pipelined / double-buffered)
                pl.BlockSpec((TB, IN_DIM), lambda i: (i, 0)),
                # weights + biases: constant index_map -> DMA once, VMEM-resident
                pl.BlockSpec((IN_DIM, HIDDEN), lambda i: (0, 0)),
                pl.BlockSpec((1, HIDDEN), lambda i: (0, 0)),
                pl.BlockSpec((HIDDEN, HIDDEN), lambda i: (0, 0)),
                pl.BlockSpec((1, HIDDEN), lambda i: (0, 0)),
                pl.BlockSpec((HIDDEN, OUT_PAD), lambda i: (0, 0)),
                pl.BlockSpec((1, OUT_PAD), lambda i: (0, 0)),
            ],
            out_specs=pl.BlockSpec((TB, OUT_PAD), lambda i: (i, 0)),
        ),
        compiler_params=pltpu.CompilerParams(
            dimension_semantics=("parallel",),   # v7x: shard batch tiles over 2 TCs
            vmem_limit_bytes=48 << 20,           # TB=1024 worst case ~16-20 MiB
        ),
        cost_estimate=pl.CostEstimate(
            flops=flops, transcendentals=0, bytes_accessed=bytes_accessed),
    )(x, w1, b1, w2, b2, w3, b3)

    return out[:B, :NUM_CLASSES].astype(jnp.float32)


def init_params(key):
    """f32 params matching nn.Linear's default U(-1/sqrt(in), 1/sqrt(in)).

    Weights stored [in_features, out_features] (transposed vs torch)."""
    def linear_init(k, in_dim, out_dim):
        kw, kb = jax.random.split(k)
        bound = 1.0 / (in_dim ** 0.5)
        w = jax.random.uniform(kw, (in_dim, out_dim), jnp.float32, -bound, bound)
        b = jax.random.uniform(kb, (1, out_dim), jnp.float32, -bound, bound)
        return w, b

    k1, k2, k3 = jax.random.split(key, 3)
    w1, b1 = linear_init(k1, IN_DIM, HIDDEN)
    w2, b2 = linear_init(k2, HIDDEN, HIDDEN)
    w3, b3 = linear_init(k3, HIDDEN, NUM_CLASSES)
    return (w1, b1, w2, b2, w3, b3)


def pack_params(params):
    """Cast weights to bf16; lane-pad only the classifier head (10 -> 128)."""
    w1, b1, w2, b2, w3, b3 = params
    w1p = w1.astype(jnp.bfloat16)                                   # (784, 512)
    w2p = w2.astype(jnp.bfloat16)                                   # (512, 512)
    w3p = jnp.pad(w3, ((0, 0), (0, OUT_PAD - NUM_CLASSES))).astype(jnp.bfloat16)
    b3p = jnp.pad(b3, ((0, 0), (0, OUT_PAD - NUM_CLASSES)))
    return (w1p, b1, w2p, b2, w3p, b3p)


if __name__ == "__main__":
    key = jax.random.PRNGKey(0)
    k_params, k_x = jax.random.split(key)

    params = init_params(k_params)
    packed = pack_params(params)

    # small batch of NCHW "images"
    B = 8
    x = jax.random.normal(k_x, (B, 1, IM_SIZE, IM_SIZE), jnp.float32)

    logits = mynn_forward(x, packed)
    logits = jax.block_until_ready(logits)
    assert logits.shape == (B, NUM_CLASSES)

    # plain-JAX reference using the same bf16-quantized weights / activations
    w1p, b1p, w2p, b2p, w3p, b3p = packed
    xf = x.reshape(B, -1).astype(jnp.bfloat16).astype(jnp.float32)
    h = jnp.maximum(xf @ w1p.astype(jnp.float32) + b1p, 0.0)
    h = jnp.maximum(h.astype(jnp.bfloat16).astype(jnp.float32)
                    @ w2p.astype(jnp.float32) + b2p, 0.0)
    ref = (h.astype(jnp.bfloat16).astype(jnp.float32)
           @ w3p[:, :NUM_CLASSES].astype(jnp.float32) + b3p[:, :NUM_CLASSES])
    ref = ref.astype(jnp.bfloat16).astype(jnp.float32)   # match bf16 writeback

    assert jnp.allclose(logits, ref, atol=2e-2, rtol=2e-2), (
        float(jnp.max(jnp.abs(logits - ref))))

    print("KERNEL_OK")
</pallas_src>

<mosaic_0001>
module attributes {stable_mosaic.version = 11 : i64} {
  func.func @mlp_kernel(%arg0: i32, %arg1: memref<8x784xf32, #tpu.memory_space<vmem>>, %arg2: memref<784x512xbf16, #tpu.memory_space<vmem>>, %arg3: memref<1x512xf32, #tpu.memory_space<vmem>>, %arg4: memref<512x512xbf16, #tpu.memory_space<vmem>>, %arg5: memref<1x512xf32, #tpu.memory_space<vmem>>, %arg6: memref<512x128xbf16, #tpu.memory_space<vmem>>, %arg7: memref<1x128xf32, #tpu.memory_space<vmem>>, %arg8: memref<8x128xbf16, #tpu.memory_space<vmem>>) attributes {dimension_semantics = [#tpu.dimension_semantics<parallel>], iteration_bounds = array<i64: 1>, scalar_prefetch = 0 : i64, scratch_operands = 0 : i64, tpu.core_type = #tpu.core_type<tc>, window_params = [{transform_indices = @transform_0, window_bounds = array<i64: 8, 784>}, {pipeline_mode = #tpu.pipeline_mode<synchronous>, transform_indices = @transform_1, window_bounds = array<i64: 784, 512>}, {pipeline_mode = #tpu.pipeline_mode<synchronous>, transform_indices = @transform_2, window_bounds = array<i64: 1, 512>}, {pipeline_mode = #tpu.pipeline_mode<synchronous>, transform_indices = @transform_3, window_bounds = array<i64: 512, 512>}, {pipeline_mode = #tpu.pipeline_mode<synchronous>, transform_indices = @transform_4, window_bounds = array<i64: 1, 512>}, {pipeline_mode = #tpu.pipeline_mode<synchronous>, transform_indices = @transform_5, window_bounds = array<i64: 512, 128>}, {pipeline_mode = #tpu.pipeline_mode<synchronous>, transform_indices = @transform_6, window_bounds = array<i64: 1, 128>}, {transform_indices = @transform_7, window_bounds = array<i64: 8, 128>}]} {
    %c0 = arith.constant 0 : index
    %c0_0 = arith.constant 0 : index
    %0 = vector.load %arg1[%c0, %c0_0] : memref<8x784xf32, #tpu.memory_space<vmem>>, vector<8x784xf32>
    %1 = arith.truncf %0 : vector<8x784xf32> to vector<8x784xbf16>
    %c0_1 = arith.constant 0 : index
    %c0_2 = arith.constant 0 : index
    %2 = vector.load %arg2[%c0_1, %c0_2] : memref<784x512xbf16, #tpu.memory_space<vmem>>, vector<784x512xbf16>
    %cst = arith.constant dense<0.000000e+00> : vector<8x512xf32>
    %3 = tpu.matmul %1, %2, %cst {dimension_numbers = #tpu.dot_dimension_numbers<[1], [0], [0], [1], [0, 0, 1, 1], [], []>} : vector<8x784xbf16>, vector<784x512xbf16>, vector<8x512xf32> -> vector<8x512xf32>
    %c0_3 = arith.constant 0 : index
    %c0_4 = arith.constant 0 : index
    %4 = vector.load %arg3[%c0_3, %c0_4] : memref<1x512xf32, #tpu.memory_space<vmem>>, vector<1x512xf32>
    %5 = vector.broadcast %4 : vector<1x512xf32> to vector<8x512xf32>
    %6 = arith.addf %3, %5 : vector<8x512xf32>
    %cst_5 = arith.constant 0.000000e+00 : f32
    %7 = vector.broadcast %cst_5 : f32 to vector<8x512xf32>
    %8 = arith.maximumf %6, %7 : vector<8x512xf32>
    %9 = arith.truncf %8 : vector<8x512xf32> to vector<8x512xbf16>
    %c0_6 = arith.constant 0 : index
    %c0_7 = arith.constant 0 : index
    %10 = vector.load %arg4[%c0_6, %c0_7] : memref<512x512xbf16, #tpu.memory_space<vmem>>, vector<512x512xbf16>
    %cst_8 = arith.constant dense<0.000000e+00> : vector<8x512xf32>
    %11 = tpu.matmul %9, %10, %cst_8 {dimension_numbers = #tpu.dot_dimension_numbers<[1], [0], [0], [1], [0, 0, 1, 1], [], []>} : vector<8x512xbf16>, vector<512x512xbf16>, vector<8x512xf32> -> vector<8x512xf32>
    %c0_9 = arith.constant 0 : index
    %c0_10 = arith.constant 0 : index
    %12 = vector.load %arg5[%c0_9, %c0_10] : memref<1x512xf32, #tpu.memory_space<vmem>>, vector<1x512xf32>
    %13 = vector.broadcast %12 : vector<1x512xf32> to vector<8x512xf32>
    %14 = arith.addf %11, %13 : vector<8x512xf32>
    %cst_11 = arith.constant 0.000000e+00 : f32
    %15 = vector.broadcast %cst_11 : f32 to vector<8x512xf32>
    %16 = arith.maximumf %14, %15 : vector<8x512xf32>
    %17 = arith.truncf %16 : vector<8x512xf32> to vector<8x512xbf16>
    %c0_12 = arith.constant 0 : index
    %c0_13 = arith.constant 0 : index
    %18 = vector.load %arg6[%c0_12, %c0_13] : memref<512x128xbf16, #tpu.memory_space<vmem>>, vector<512x128xbf16>
    %cst_14 = arith.constant dense<0.000000e+00> : vector<8x128xf32>
    %19 = tpu.matmul %17, %18, %cst_14 {dimension_numbers = #tpu.dot_dimension_numbers<[1], [0], [0], [1], [0, 0, 1, 1], [], []>} : vector<8x512xbf16>, vector<512x128xbf16>, vector<8x128xf32> -> vector<8x128xf32>
    %c0_15 = arith.constant 0 : index
    %c0_16 = arith.constant 0 : index
    %20 = vector.load %arg7[%c0_15, %c0_16] : memref<1x128xf32, #tpu.memory_space<vmem>>, vector<1x128xf32>
    %21 = vector.broadcast %20 : vector<1x128xf32> to vector<8x128xf32>
    %22 = arith.addf %19, %21 : vector<8x128xf32>
    %23 = arith.truncf %22 : vector<8x128xf32> to vector<8x128xbf16>
    %c0_17 = arith.constant 0 : index
    %c0_18 = arith.constant 0 : index
    %24 = vector.load %arg8[%c0_17, %c0_18] : memref<8x128xbf16, #tpu.memory_space<vmem>>, vector<8x128xbf16>
    tpu.vector_store %arg8[%c0_17, %c0_18], %23 {strides = array<i32>} : memref<8x128xbf16, #tpu.memory_space<vmem>>, vector<8x128xbf16>,
    return
  }
  func.func @transform_0(%arg0: i32) -> (i32, i32) {
    %c0_i32 = arith.constant 0 : i32
    %c0_i32_0 = arith.constant 0 : i32
    return %arg0, %c0_i32 : i32, i32
  }
  func.func @transform_1(%arg0: i32) -> (i32, i32) {
    %c0_i32 = arith.constant 0 : i32
    %c0_i32_0 = arith.constant 0 : i32
    %c0_i32_1 = arith.constant 0 : i32
    return %c0_i32, %c0_i32_0 : i32, i32
  }
  func.func @transform_2(%arg0: i32) -> (i32, i32) {
    %c0_i32 = arith.constant 0 : i32
    %c0_i32_0 = arith.constant 0 : i32
    %c0_i32_1 = arith.constant 0 : i32
    return %c0_i32, %c0_i32_0 : i32, i32
  }
  func.func @transform_3(%arg0: i32) -> (i32, i32) {
    %c0_i32 = arith.constant 0 : i32
    %c0_i32_0 = arith.constant 0 : i32
    %c0_i32_1 = arith.constant 0 : i32
    return %c0_i32, %c0_i32_0 : i32, i32
  }
  func.func @transform_4(%arg0: i32) -> (i32, i32) {
    %c0_i32 = arith.constant 0 : i32
    %c0_i32_0 = arith.constant 0 : i32
    %c0_i32_1 = arith.constant 0 : i32
    return %c0_i32, %c0_i32_0 : i32, i32
  }
  func.func @transform_5(%arg0: i32) -> (i32, i32) {
    %c0_i32 = arith.constant 0 : i32
    %c0_i32_0 = arith.constant 0 : i32
    %c0_i32_1 = arith.constant 0 : i32
    return %c0_i32, %c0_i32_0 : i32, i32
  }
  func.func @transform_6(%arg0: i32) -> (i32, i32) {
    %c0_i32 = arith.constant 0 : i32
    %c0_i32_0 = arith.constant 0 : i32
    %c0_i32_1 = arith.constant 0 : i32
    return %c0_i32, %c0_i32_0 : i32, i32
  }
  func.func @transform_7(%arg0: i32) -> (i32, i32) {
    %c0_i32 = arith.constant 0 : i32
    %c0_i32_0 = arith.constant 0 : i32
    return %arg0, %c0_i32 : i32, i32
  }
}

</mosaic_0001>

<bundles_post_ra>
// kernel: tpu_custom_call.1
= control target key start
LH: loop header
LB: loop body
LE: loop exit
PB: predicated region body
PF: predicated region fallthrough
CT: control target
= control target key end

     0   :  { %12 = vsyncpa [#allocation3], 0  ;;  %s5202_s0 = inlined_call_operand.hbm [shape: f32[8,784], index: 0, kind: input, shape index: {}]   ;;  %s5203_s1 = inlined_call_operand.hbm [shape: bf16[784,512], index: 1, kind: input, shape index: {}]   ;;  %s5204_s2 = inlined_call_operand.hbm [shape: f32[1,512], index: 2, kind: input, shape index: {}]   ;;  %s5205_s3 = inlined_call_operand.hbm [shape: bf16[512,512], index: 3, kind: input, shape index: {}]   ;;  %s5206_s4 = inlined_call_operand.hbm [shape: f32[1,512], index: 4, kind: input, shape index: {}]   ;;  %s5207_s5 = inlined_call_operand.hbm [shape: bf16[512,128], index: 5, kind: input, shape index: {}]   ;;  %s5208_s6 = inlined_call_operand.vmem [shape: f32[1,128], index: 6, kind: input, shape index: {}]   ;;  %s5209_s7 = inlined_call_operand.hbm [shape: bf16[8,128], index: 7, kind: output, shape index: {}]  }
   0x1   :  { %13 = vsyncpa [#allocation6], 0 }
   0x2   :  { %14 = vsyncpa [#allocation9], 0 }
   0x3   :  { %15 = vsyncpa [#allocation12], 0  ;;  %s32_s26 = sshll.u32 %s5203_s1, 4  ;;  %s33_s26 = int_to_ptr.hbm [resolvable:$true] %s32_s26 }
   0x4   :  { %16 = vsyncpa [#allocation4], 0  ;;  %s4994_s27 = smov [#allocation5]   ;;  %s56_s8 = sshll.u32 %s5205_s3, 4  ;;  %s57_s8 = int_to_ptr.hbm [resolvable:$true] %s56_s8 }
   0x5   :  { %s34_s28 = sshll.u32 %s4994_s27, 4  ;;  %s4995_s9 = smov 256   ;;  %s35_s28 = int_to_ptr.vmem [resolvable:$true] %s34_s28 }
   0x6   :  { %s4996_s10 = smov 16   ;;  %s4997_s11 = smov [#allocation8]  }
   0x7   :  { %40 = dma.hbm_to_vmem [thread:$0]  %s33_s26, 25088, %s35_s28, [#allocation6], %s4995_s9, %s4995_s9, %s4996_s10  }
   0x8   :  { %s58_s12 = sshll.u32 %s4997_s11, 4  ;;  %s22_s15 = sshll.u32 %s5202_s0, 4  ;;  %s59_s12 = int_to_ptr.vmem [resolvable:$true] %s58_s12  ;;  %s23_s15 = int_to_ptr.hbm [resolvable:$true] %s22_s15 }
   0x9   :  { %64 = dma.hbm_to_vmem [thread:$0]  %s57_s8, 16384, %s59_s12, [#allocation9], %s4995_s9, %s4995_s9, %s4996_s10  }
   0xa   :  { %s46_s17 = sshll.u32 %s5204_s2, 4  ;;  %s4998_s18 = smov [#allocation2]   ;;  %s47_s17 = int_to_ptr.hbm [resolvable:$true] %s46_s17 }
   0xb   :  { %s24_s19 = sshll.u32 %s4998_s18, 4  ;;  %s4999_s3 = smov [#allocation7]   ;;  %s25_s19 = int_to_ptr.vmem [resolvable:$true] %s24_s19 }
   0xc   :  { %27 = dma.hbm_to_vmem [thread:$0]  %s23_s15, 896, %s25_s19, [#allocation3]  }
   0xd   :  { %s48_s20 = sshll.u32 %s4999_s3, 4  ;;  %s70_s23 = sshll.u32 %s5206_s4, 4  ;;  %s49_s20 = int_to_ptr.vmem [resolvable:$true] %s48_s20  ;;  %s71_s23 = int_to_ptr.hbm [resolvable:$true] %s70_s23 }
   0xe   :  { %51 = dma.hbm_to_vmem [thread:$0]  %s47_s17, 64, %s49_s20, [#allocation6]  }
   0xf   :  { %s80_s25 = sshll.u32 %s5207_s5, 4  ;;  %s5000_s26 = smov [#allocation10]   ;;  %s81_s25 = int_to_ptr.hbm [resolvable:$true] %s80_s25 }
  0x10   :  { %s72_s2 = sshll.u32 %s5000_s26, 4  ;;  %s5001_s27 = smov [#allocation11]   ;;  %s73_s2 = int_to_ptr.vmem [resolvable:$true] %s72_s2 }
  0x11   :  { %75 = dma.hbm_to_vmem [thread:$0]  %s71_s23, 64, %s73_s2, [#allocation9]  }
  0x12   :  { %s82_s28 = sshll.u32 %s5001_s27, 4  ;;  %s5002_s29 = smov 64   ;;  %s83_s28 = int_to_ptr.vmem [resolvable:$true] %s82_s28 }
  0x13   :  { %s5003_s30 = smov 4  }
  0x14   :  { %88 = dma.hbm_to_vmem [thread:$0]  %s81_s25, 4096, %s83_s28, [#allocation12], %s5002_s29, %s5002_s29, %s5003_s30  }
  0x15   :  { %4984 = dma.done.wait [#allocation3], 896  }
  0x16   :  { %4985 = vsyncadd [#allocation3], 4294966400 }
  0x17   :  { %4986 = dma.done.wait [#allocation6], 25152  }
  0x18   :  { %4987 = vsyncadd [#allocation6], 4294942144 }
  0x19   :  { %4988 = dma.done.wait [#allocation9], 16448  }
  0x1a   :  { %4989 = vsyncadd [#allocation9], 4294950848 }
  0x1b   :  { %4990 = dma.done.wait [#allocation12], 4096  }
  0x1c   :  { %4991 = vsyncadd [#allocation12], 4294963200  ;;  %v3134_v0 = vld [vmem:[#allocation5 + $0xe0] sm:$0xf]  ;;  %v4478_v1 = vld [vmem:[#allocation5 + $0xec] sm:$0xf0] }
  0x1d   :  { %v3262_v2 = vld [vmem:[#allocation5 + $0x1e0] sm:$0xf]  ;;  %v3135_v3 = vor.u32 %v4478_v1, %v3134_v0  ;;  %v4510_v4 = vld [vmem:[#allocation5 + $0x1ec] sm:$0xf0]  ;;  %vm1316_vm0 = vcmask 130048   ;;  %s5004_s8 = smov [#allocation13]  }
  0x1e   :  { %v3390_v5 = vld [vmem:[#allocation5 + $0x2e0] sm:$0xf]  ;;  %v4542_v6 = vld [vmem:[#allocation5 + $0x2ec] sm:$0xf0]  ;;  %v3263_v7 = vor.u32 %v4510_v4, %v3262_v2  ;;  %s3005_s9 = sshll.u32 %s5004_s8, 4  ;;  %s3007_s12 = sshll.u32 %s5209_s7, 4  ;;  %s3006_s9 = int_to_ptr.vmem [resolvable:$true] %s3005_s9  ;;  %s3008_s12 = int_to_ptr.hbm [resolvable:$true] %s3007_s12 }
  0x1f   :  { %v3391_v8 = vor.u32 %v4542_v6, %v3390_v5  ;;  %v3518_v9 = vld [vmem:[#allocation5 + $0x3e0] sm:$0xf]  ;;  %v4574_v10 = vld [vmem:[#allocation5 + $0x3ec] sm:$0xf0]  ;;  %1320 = vmatpush.bf16.msra.mxu0 %v3135_v3 }
  0x20   :  { %v3118_v11 = vld [vmem:[#allocation5 + $0xc0] sm:$0xf]  ;;  %v3519_v12 = vor.u32 %v4574_v10, %v3518_v9  ;;  %v4474_v13 = vld [vmem:[#allocation5 + $0xcc] sm:$0xf0]  ;;  %1333 = vmatpush.bf16.msra.mxu1 %v3263_v7 }
  0x21   :  { %v3246_v14 = vld [vmem:[#allocation5 + $0x1c0] sm:$0xf]  ;;  %v4506_v15 = vld [vmem:[#allocation5 + $0x1cc] sm:$0xf0]  ;;  %1346 = vmatpush.bf16.msra.mxu2 %v3391_v8  ;;  %v3119_v16 = vor.u32 %v4474_v13, %v3118_v11 }
  0x22   :  { %v3247_v17 = vor.u32 %v4506_v15, %v3246_v14  ;;  %v3374_v18 = vld [vmem:[#allocation5 + $0x2c0] sm:$0xf]  ;;  %v4538_v19 = vld [vmem:[#allocation5 + $0x2cc] sm:$0xf0]  ;;  %1359 = vmatpush.bf16.msra.mxu3 %v3519_v12 }
  0x23   :  { %v3502_v20 = vld [vmem:[#allocation5 + $0x3c0] sm:$0xf]  ;;  %v3375_v21 = vor.u32 %v4538_v19, %v3374_v18  ;;  %v4570_v22 = vld [vmem:[#allocation5 + $0x3cc] sm:$0xf0]  ;;  %1321 = vmatpush.bf16.msra.mxu0 %v3119_v16 }
  0x24   :  { %v3102_v23 = vld [vmem:[#allocation5 + $0xa0] sm:$0xf]  ;;  %v4470_v24 = vld [vmem:[#allocation5 + $0xac] sm:$0xf0]  ;;  %v3503_v25 = vor.u32 %v4570_v22, %v3502_v20  ;;  %1334 = vmatpush.bf16.msra.mxu1 %v3247_v17 }
  0x25   :  { %v3230_v26 = vld [vmem:[#allocation5 + $0x1a0] sm:$0xf]  ;;  %v4502_v27 = vld [vmem:[#allocation5 + $0x1ac] sm:$0xf0]  ;;  %v3103_v29 = vor.u32 %v4470_v24, %v3102_v23  ;;  %1347 = vmatpush.bf16.msra.mxu2 %v3375_v21 }
  0x26   :  { %v3358_v28 = vld [vmem:[#allocation5 + $0x2a0] sm:$0xf]  ;;  %v4534_v30 = vld [vmem:[#allocation5 + $0x2ac] sm:$0xf0]  ;;  %v3231_v33 = vor.u32 %v4502_v27, %v3230_v26  ;;  %1360 = vmatpush.bf16.msra.mxu3 %v3503_v25 }
  0x27   :  { %v3486_v31 = vld [vmem:[#allocation5 + $0x3a0] sm:$0xf]  ;;  %v4566_v32 = vld [vmem:[#allocation5 + $0x3ac] sm:$0xf0]  ;;  %v3359_v34 = vor.u32 %v4534_v30, %v3358_v28  ;;  %1322 = vmatpush.bf16.msra.mxu0 %v3103_v29 }
  0x28   :  { %v3086_v35 = vld [vmem:[#allocation5 + $0x80] sm:$0xf]  ;;  %v4466_v36 = vld [vmem:[#allocation5 + $0x8c] sm:$0xf0]  ;;  %v3487_v38 = vor.u32 %v4566_v32, %v3486_v31  ;;  %1335 = vmatpush.bf16.msra.mxu1 %v3231_v33  ;;  %v4476_v33 = vld [vmem:[#allocation5 + $0xe4] sm:$0xf] }
  0x29   :  { %v3214_v37 = vld [vmem:[#allocation5 + $0x180] sm:$0xf]  ;;  %v4498_v39 = vld [vmem:[#allocation5 + $0x18c] sm:$0xf0]  ;;  %v3087_v44 = vor.u32 %v4466_v36, %v3086_v35  ;;  %1348 = vmatpush.bf16.msra.mxu2 %v3359_v34  ;;  %v3136_v34 = vld [vmem:[#allocation5 + $0xf0] sm:$0xf0] }
  0x2a   :  { %v3342_v40 = vld [vmem:[#allocation5 + $0x280] sm:$0xf]  ;;  %v4530_v41 = vld [vmem:[#allocation5 + $0x28c] sm:$0xf0]  ;;  %v3215_v45 = vor.u32 %v4498_v39, %v3214_v37  ;;  %1361 = vmatpush.bf16.msra.mxu3 %v3487_v38  ;;  %v118_v35 = vld [vmem:[#allocation2 + $0x10] sm:$0xff] }
  0x2b   :  { %v3470_v42 = vld [vmem:[#allocation5 + $0x380] sm:$0xf]  ;;  %v4562_v43 = vld [vmem:[#allocation5 + $0x38c] sm:$0xf0]  ;;  %v3343_v46 = vor.u32 %v4530_v41, %v3342_v40  ;;  %1323 = vmatpush.bf16.msra.mxu0 %v3087_v44  ;;  %v116_v40 = vld [vmem:[#allocation2] sm:$0xff] }
  0x2c   :  { %v3070_v47 = vld [vmem:[#allocation5 + $0x60] sm:$0xf]  ;;  %v4462_v48 = vld [vmem:[#allocation5 + $0x6c] sm:$0xf0]  ;;  %v3471_v50 = vor.u32 %v4562_v43, %v3470_v42  ;;  %1336 = vmatpush.bf16.msra.mxu1 %v3215_v45  ;;  %v4508_v43 = vld [vmem:[#allocation5 + $0x1e4] sm:$0xf] }
  0x2d   :  { %v3198_v49 = vld [vmem:[#allocation5 + $0x160] sm:$0xf]  ;;  %v4494_v51 = vld [vmem:[#allocation5 + $0x16c] sm:$0xf0]  ;;  %v3071_v56 = vor.u32 %v4462_v48, %v3070_v47  ;;  %1349 = vmatpush.bf16.msra.mxu2 %v3343_v46  ;;  %v3264_v44 = vld [vmem:[#allocation5 + $0x1f0] sm:$0xf0]  ;;  %v3139_v47 = vor.u32 %v4476_v33, %v3136_v34 }
  0x2e   :  { %v3326_v52 = vld [vmem:[#allocation5 + $0x260] sm:$0xf]  ;;  %v4526_v53 = vld [vmem:[#allocation5 + $0x26c] sm:$0xf0]  ;;  %v3199_v57 = vor.u32 %v4494_v51, %v3198_v49  ;;  %1362 = vmatpush.bf16.msra.mxu3 %v3471_v50  ;;  %v5063_v51 = vpack.c.bf16 %v118_v35, %v118_v35  ;;  %v4492_v35 = vld [vmem:[#allocation5 + $0x164] sm:$0xf] }
  0x2f   :  { %v3454_v54 = vld [vmem:[#allocation5 + $0x360] sm:$0xf]  ;;  %v4558_v55 = vld [vmem:[#allocation5 + $0x36c] sm:$0xf0]  ;;  %v3327_v58 = vor.u32 %v4526_v53, %v3326_v52  ;;  %1324 = vmatpush.bf16.msra.mxu0 %v3071_v56  ;;  %v4472_v53 = vld [vmem:[#allocation5 + $0xc4] sm:$0xf] }
  0x30   :  { %v3054_v59 = vld [vmem:[#allocation5 + $0x40] sm:$0xf]  ;;  %v4458_v60 = vld [vmem:[#allocation5 + $0x4c] sm:$0xf0]  ;;  %v3455_v62 = vor.u32 %v4558_v55, %v3454_v54  ;;  %1337 = vmatpush.bf16.msra.mxu1 %v3199_v57  ;;  %v3120_v54 = vld [vmem:[#allocation5 + $0xd0] sm:$0xf0]  ;;  %v5065_v55 = vpack.c.bf16 %v116_v40, %v116_v40 }
  0x31   :  { %v3182_v61 = vld [vmem:[#allocation5 + $0x140] sm:$0xf]  ;;  %v4490_v63 = vld [vmem:[#allocation5 + $0x14c] sm:$0xf0]  ;;  %v3055_v4 = vor.u32 %v4458_v60, %v3054_v59  ;;  %1350 = vmatpush.bf16.msra.mxu2 %v3327_v58  ;;  %v3267_v59 = vor.u32 %v4508_v43, %v3264_v44  ;;  %v4456_v43 = vld [vmem:[#allocation5 + $0x44] sm:$0xf] }
  0x32   :  { %v3310_v0 = vld [vmem:[#allocation5 + $0x240] sm:$0xf]  ;;  %v4522_v1 = vld [vmem:[#allocation5 + $0x24c] sm:$0xf0]  ;;  %v3183_v5 = vor.u32 %v4490_v63, %v3182_v61  ;;  %1363 = vmatpush.bf16.msra.mxu3 %v3455_v62  ;;  %v4504_v61 = vld [vmem:[#allocation5 + $0x1c4] sm:$0xf] }
  0x33   :  { %v3438_v2 = vld [vmem:[#allocation5 + $0x340] sm:$0xf]  ;;  %v4554_v3 = vld [vmem:[#allocation5 + $0x34c] sm:$0xf0]  ;;  %v3311_v6 = vor.u32 %v4522_v1, %v3310_v0  ;;  %1325 = vmatpush.bf16.msra.mxu0 %v3055_v4  ;;  %v3248_v62 = vld [vmem:[#allocation5 + $0x1d0] sm:$0xf0]  ;;  %v3123_v0 = vor.u32 %v4472_v53, %v3120_v54 }
  0x34   :  { %v3038_v7 = vld [vmem:[#allocation5 + $0x20] sm:$0xf]  ;;  %v4454_v8 = vld [vmem:[#allocation5 + $0x2c] sm:$0xf0]  ;;  %v3439_v10 = vor.u32 %v4554_v3, %v3438_v2  ;;  %1338 = vmatpush.bf16.msra.mxu1 %v3183_v5  ;;  %v4468_v5 = vld [vmem:[#allocation5 + $0xa4] sm:$0xf] }
  0x35   :  { %v3166_v9 = vld [vmem:[#allocation5 + $0x120] sm:$0xf]  ;;  %v4486_v11 = vld [vmem:[#allocation5 + $0x12c] sm:$0xf0]  ;;  %v3039_v16 = vor.u32 %v4454_v8, %v3038_v7  ;;  %1351 = vmatpush.bf16.msra.mxu2 %v3311_v6  ;;  %v3104_v6 = vld [vmem:[#allocation5 + $0xb0] sm:$0xf0]  ;;  %v3251_v8 = vor.u32 %v4504_v61, %v3248_v62 }
  0x36   :  { %v3294_v12 = vld [vmem:[#allocation5 + $0x220] sm:$0xf]  ;;  %v4518_v13 = vld [vmem:[#allocation5 + $0x22c] sm:$0xf0]  ;;  %v3167_v20 = vor.u32 %v4486_v11, %v3166_v9  ;;  %1364 = vmatpush.bf16.msra.mxu3 %v3439_v10  ;;  %v4500_v10 = vld [vmem:[#allocation5 + $0x1a4] sm:$0xf] }
  0x37   :  { %v3422_v14 = vld [vmem:[#allocation5 + $0x320] sm:$0xf]  ;;  %v4550_v15 = vld [vmem:[#allocation5 + $0x32c] sm:$0xf0]  ;;  %v3295_v21 = vor.u32 %v4518_v13, %v3294_v12  ;;  %1326 = vmatpush.bf16.msra.mxu0 %v3039_v16  ;;  %v3232_v11 = vld [vmem:[#allocation5 + $0x1b0] sm:$0xf0]  ;;  %v3107_v13 = vor.u32 %v4468_v5, %v3104_v6 }
  0x38   :  { %v3022_v17 = vld [vmem:[#allocation5] sm:$0xf]  ;;  %v4450_v18 = vld [vmem:[#allocation5 + $0xc] sm:$0xf0]  ;;  %v3423_v25 = vor.u32 %v4550_v15, %v3422_v14  ;;  %1339 = vmatpush.bf16.msra.mxu1 %v3167_v20  ;;  %v3235_v20 = vor.u32 %v4500_v10, %v3232_v11  ;;  %v3056_v44 = vld [vmem:[#allocation5 + $0x50] sm:$0xf0] }
  0x39   :  { %v3150_v19 = vld [vmem:[#allocation5 + $0x100] sm:$0xf]  ;;  %v4482_v22 = vld [vmem:[#allocation5 + $0x10c] sm:$0xf0]  ;;  %v3023_v32 = vor.u32 %v4450_v18, %v3022_v17  ;;  %1352 = vmatpush.bf16.msra.mxu2 %v3295_v21  ;;  %v4464_v18 = vld [vmem:[#allocation5 + $0x84] sm:$0xf] }
  0x3a   :  { %v3278_v23 = vld [vmem:[#allocation5 + $0x200] sm:$0xf]  ;;  %v4514_v24 = vld [vmem:[#allocation5 + $0x20c] sm:$0xf0]  ;;  %v3151_v36 = vor.u32 %v4482_v22, %v3150_v19  ;;  %1365 = vmatpush.bf16.msra.mxu3 %v3423_v25  ;;  %v3088_v19 = vld [vmem:[#allocation5 + $0x90] sm:$0xf0] }
  0x3b   :  { %v3406_v26 = vld [vmem:[#allocation5 + $0x300] sm:$0xf]  ;;  %v4546_v27 = vld [vmem:[#allocation5 + $0x30c] sm:$0xf0]  ;;  %v3279_v37 = vor.u32 %v4514_v24, %v3278_v23  ;;  %1327 = vmatpush.bf16.msra.mxu0 %v3023_v32  ;;  %v4496_v22 = vld [vmem:[#allocation5 + $0x184] sm:$0xf]  ;;  %v3091_v25 = vor.u32 %v4464_v18, %v3088_v19 }
  0x3c   :  { %v3646_v28 = vld [vmem:[#allocation5 + $0x4e0] sm:$0xf]  ;;  %v4606_v29 = vld [vmem:[#allocation5 + $0x4ec] sm:$0xf0]  ;;  %v3407_v41 = vor.u32 %v4546_v27, %v3406_v26  ;;  %1340 = vmatpush.bf16.msra.mxu1 %v3151_v36  ;;  %v3216_v23 = vld [vmem:[#allocation5 + $0x190] sm:$0xf0] }
  0x3d   :  { %v3774_v30 = vld [vmem:[#allocation5 + $0x5e0] sm:$0xf]  ;;  %v4638_v31 = vld [vmem:[#allocation5 + $0x5ec] sm:$0xf0]  ;;  %v3647_v42 = vor.u32 %v4606_v29, %v3646_v28  ;;  %1353 = vmatpush.bf16.msra.mxu2 %v3279_v37  ;;  %v122_v32 = vld [vmem:[#allocation2 + $0x30] sm:$0xff]  ;;  %v3219_v33 = vor.u32 %v4496_v22, %v3216_v23 }
  0x3e   :  { %v3790_v38 = vld [vmem:[#allocation5 + $0x600] sm:$0xf]  ;;  %v4642_v39 = vld [vmem:[#allocation5 + $0x60c] sm:$0xf0]  ;;  %v3775_v46 = vor.u32 %v4638_v31, %v3774_v30  ;;  %1366 = vmatpush.bf16.msra.mxu3 %v3407_v41  ;;  %1328 = vmatmul.bf16.vlgmr.msra.gmra.mxu0 %v5065_v55  ;;  %v4460_v30 = vld [vmem:[#allocation5 + $0x64] sm:$0xf] }
  0x3f   :  { %v119_v45 = vld [vmem:[#allocation2 + $0x18] sm:$0xff]  ;;  %v4602_v49 = vld [vmem:[#allocation5 + $0x4cc] sm:$0xf0]  ;;  %v3791_v56 = vor.u32 %v4642_v39, %v3790_v38  ;;  %1372 = vmatpush.bf16.msrb.mxu0 %v3647_v42  ;;  %v3072_v31 = vld [vmem:[#allocation5 + $0x70] sm:$0xf0] }
  0x40   :  { %v3630_v48 = vld [vmem:[#allocation5 + $0x4c0] sm:$0xf]  ;;  %v4634_v52 = vld [vmem:[#allocation5 + $0x5cc] sm:$0xf0]  ;;  %v5067_v57 = vpack.c.bf16 %v119_v45, %v119_v45  ;;  %1385 = vmatpush.bf16.msrb.mxu1 %v3775_v46  ;;  %1354 = vmatmul.bf16.vlgmr.msra.gmra.mxu2 %v5063_v51  ;;  %v3200_v36 = vld [vmem:[#allocation5 + $0x170] sm:$0xf0]  ;;  %v3075_v38 = vor.u32 %v4460_v30, %v3072_v31  ;;  %v5075_v45 = vpack.c.bf16 %v122_v32, %v122_v32 }
  0x41   :  { %v3758_v50 = vld [vmem:[#allocation5 + $0x5c0] sm:$0xf]  ;;  %v117_v58 = vld [vmem:[#allocation2 + $0x8] sm:$0xff]  ;;  %v3631_v60 = vor.u32 %v4602_v49, %v3630_v48  ;;  %1405 = vmatpush.bf16.msrb.mxu2 %v3791_v56  ;;  %v3203_v46 = vor.u32 %v4492_v35, %v3200_v36  ;;  %v4488_v48 = vld [vmem:[#allocation5 + $0x144] sm:$0xf] }
  0x42   :  { %1411 = vmatpush.bf16.msrb.mxu3 %v3139_v47  ;;  %v3759_v63 = vor.u32 %v4634_v52, %v3758_v50  ;;  %v3614_v1 = vld [vmem:[#allocation5 + $0x4a0] sm:$0xf]  ;;  %v4598_v2 = vld [vmem:[#allocation5 + $0x4ac] sm:$0xf0]  ;;  %v5071_v7 = vpack.c.bf16 %v117_v58, %v117_v58  ;;  %v3184_v49 = vld [vmem:[#allocation5 + $0x150] sm:$0xf0]  ;;  %v3059_v52 = vor.u32 %v4456_v43, %v3056_v44 }
  0x43   :  { %v3742_v3 = vld [vmem:[#allocation5 + $0x5a0] sm:$0xf]  ;;  %v4630_v4 = vld [vmem:[#allocation5 + $0x5ac] sm:$0xf0]  ;;  %1367 = vmatmul.bf16.vlgmr.msra.gmra.mxu3 %v5067_v57  ;;  %1373 = vmatpush.bf16.msrb.mxu0 %v3631_v60  ;;  %v3615_v9 = vor.u32 %v4598_v2, %v3614_v1  ;;  %v3040_v60 = vld [vmem:[#allocation5 + $0x30] sm:$0xf0]  ;;  %v3187_v61 = vor.u32 %v4488_v48, %v3184_v49 }
  0x44   :  { %1386 = vmatpush.bf16.msrb.mxu1 %v3759_v63  ;;  %v3743_v12 = vor.u32 %v4630_v4, %v3742_v3  ;;  %v3598_v14 = vld [vmem:[#allocation5 + $0x480] sm:$0xf]  ;;  %v4594_v15 = vld [vmem:[#allocation5 + $0x48c] sm:$0xf0]  ;;  %v4484_v63 = vld [vmem:[#allocation5 + $0x124] sm:$0xf] }
  0x45   :  { %1424 = vmatpush.bf16.msra.mxu2 %v3267_v59  ;;  %v3726_v16 = vld [vmem:[#allocation5 + $0x580] sm:$0xf]  ;;  %1341 = vmatmul.bf16.vlgmr.msra.gmra.mxu1 %v5071_v7  ;;  %v4626_v17 = vld [vmem:[#allocation5 + $0x58c] sm:$0xf0]  ;;  %v3599_v21 = vor.u32 %v4594_v15, %v3598_v14  ;;  %v4452_v59 = vld [vmem:[#allocation5 + $0x24] sm:$0xf] }
  0x46   :  { %1412 = vmatpush.bf16.msrb.mxu3 %v3123_v0  ;;  %v3727_v24 = vor.u32 %v4626_v17, %v3726_v16  ;;  %v3582_v26 = vld [vmem:[#allocation5 + $0x460] sm:$0xf]  ;;  %v4590_v27 = vld [vmem:[#allocation5 + $0x46c] sm:$0xf0]  ;;  %v3168_v0 = vld [vmem:[#allocation5 + $0x130] sm:$0xf0]  ;;  %v3043_v3 = vor.u32 %v4452_v59, %v3040_v60 }
  0x47   :  { %1374 = vmatpush.bf16.msrb.mxu0 %v3615_v9  ;;  %v3710_v28 = vld [vmem:[#allocation5 + $0x560] sm:$0xf]  ;;  %v4622_v29 = vld [vmem:[#allocation5 + $0x56c] sm:$0xf0]  ;;  %v3583_v34 = vor.u32 %v4590_v27, %v3582_v26  ;;  %v3024_v9 = vld [vmem:[#allocation5 + $0x10] sm:$0xf0]  ;;  %v3171_v14 = vor.u32 %v4484_v63, %v3168_v0 }
  0x48   :  { %1387 = vmatpush.bf16.msrb.mxu1 %v3743_v12  ;;  %v3711_v37 = vor.u32 %v4622_v29, %v3710_v28  ;;  %v3566_v39 = vld [vmem:[#allocation5 + $0x440] sm:$0xf]  ;;  %v4586_v40 = vld [vmem:[#allocation5 + $0x44c] sm:$0xf0]  ;;  %v4540_v10 = vld [vmem:[#allocation5 + $0x2e4] sm:$0xf] }
  0x49   :  { %1425 = vmatpush.bf16.msra.mxu2 %v3251_v8  ;;  %v3694_v41 = vld [vmem:[#allocation5 + $0x540] sm:$0xf]  ;;  %v4618_v42 = vld [vmem:[#allocation5 + $0x54c] sm:$0xf0]  ;;  %v3567_v47 = vor.u32 %v4586_v40, %v3566_v39  ;;  %v4448_v8 = vld [vmem:[#allocation5 + $0x4] sm:$0xf] }
  0x4a   :  { %1413 = vmatpush.bf16.msrb.mxu3 %v3107_v13  ;;  %v3695_v50 = vor.u32 %v4618_v42, %v3694_v41  ;;  %v3550_v53 = vld [vmem:[#allocation5 + $0x420] sm:$0xf]  ;;  %v4582_v54 = vld [vmem:[#allocation5 + $0x42c] sm:$0xf0]  ;;  %v3392_v11 = vld [vmem:[#allocation5 + $0x2f0] sm:$0xf0] }
  0x4b   :  { %1375 = vmatpush.bf16.msrb.mxu0 %v3599_v21  ;;  %v3678_v56 = vld [vmem:[#allocation5 + $0x520] sm:$0xf]  ;;  %v4614_v58 = vld [vmem:[#allocation5 + $0x52c] sm:$0xf0]  ;;  %v3551_v62 = vor.u32 %v4582_v54, %v3550_v53  ;;  %v4572_v12 = vld [vmem:[#allocation5 + $0x3e4] sm:$0xf] }
  0x4c   :  { %1388 = vmatpush.bf16.msrb.mxu1 %v3727_v24  ;;  %v3534_v1 = vld [vmem:[#allocation5 + $0x400] sm:$0xf]  ;;  %v3679_v2 = vor.u32 %v4614_v58, %v3678_v56  ;;  %v4578_v4 = vld [vmem:[#allocation5 + $0x40c] sm:$0xf0]  ;;  %v3520_v13 = vld [vmem:[#allocation5 + $0x3f0] sm:$0xf0]  ;;  %v3395_v24 = vor.u32 %v4540_v10, %v3392_v11 }
  0x4d   :  { %1426 = vmatpush.bf16.msra.mxu2 %v3235_v20  ;;  %v3662_v5 = vld [vmem:[#allocation5 + $0x500] sm:$0xf]  ;;  %v4610_v6 = vld [vmem:[#allocation5 + $0x50c] sm:$0xf0]  ;;  %v3535_v15 = vor.u32 %v4578_v4, %v3534_v1  ;;  %v4604_v16 = vld [vmem:[#allocation5 + $0x4e4] sm:$0xf]  ;;  %v3027_v20 = vor.u32 %v4448_v8, %v3024_v9 }
  0x4e   :  { %1414 = vmatpush.bf16.msrb.mxu3 %v3091_v25  ;;  %v3648_v17 = vld [vmem:[#allocation5 + $0x4f0] sm:$0xf0]  ;;  %v120_v18 = vld [vmem:[#allocation2 + $0x20] sm:$0xff]  ;;  %v3663_v19 = vor.u32 %v4610_v6, %v3662_v5  ;;  %v4480_v21 = vld [vmem:[#allocation5 + $0x104] sm:$0xf]  ;;  %v3523_v25 = vor.u32 %v4572_v12, %v3520_v13 }
  0x4f   :  { %1376 = vmatpush.bf16.msrb.mxu0 %v3583_v34  ;;  %v3152_v22 = vld [vmem:[#allocation5 + $0x110] sm:$0xf0]  ;;  %v4636_v26 = vld [vmem:[#allocation5 + $0x5e4] sm:$0xf]  ;;  %v3651_v29 = vor.u32 %v4604_v16, %v3648_v17  ;;  %v5079_v30 = vpack.c.bf16 %v120_v18, %v120_v18 }
  0x50   :  { %1389 = vmatpush.bf16.msrb.mxu1 %v3711_v37  ;;  %3804 = vmatmul.msk.bf16.vlgmr.msrb.gmra.mxu2 %vm1316_vm0, %v5075_v45  ;;  %v121_v23 = vld [vmem:[#allocation2 + $0x28] sm:$0xff]  ;;  %v4536_v28 = vld [vmem:[#allocation5 + $0x2c4] sm:$0xf]  ;;  %v3155_v34 = vor.u32 %v4480_v21, %v3152_v22 }
  0x51   :  { %1427 = vmatpush.bf16.msra.mxu2 %v3219_v33  ;;  %v3776_v27 = vld [vmem:[#allocation5 + $0x5f0] sm:$0xf0]  ;;  %v4568_v32 = vld [vmem:[#allocation5 + $0x3c4] sm:$0xf]  ;;  %v5081_v35 = vpack.c.bf16 %v121_v23, %v121_v23 }
  0x52   :  { %1415 = vmatpush.bf16.msrb.mxu3 %v3075_v38  ;;  %v3376_v31 = vld [vmem:[#allocation5 + $0x2d0] sm:$0xf0]  ;;  %v4600_v36 = vld [vmem:[#allocation5 + $0x4c4] sm:$0xf]  ;;  %v3779_v38 = vor.u32 %v4636_v26, %v3776_v27 }
  0x53   :  { %1377 = vmatpush.bf16.msrb.mxu0 %v3567_v47  ;;  %v3504_v33 = vld [vmem:[#allocation5 + $0x3d0] sm:$0xf0]  ;;  %v3379_v39 = vor.u32 %v4536_v28, %v3376_v31  ;;  %v4632_v41 = vld [vmem:[#allocation5 + $0x5c4] sm:$0xf] }
  0x54   :  { %1390 = vmatpush.bf16.msrb.mxu1 %v3695_v50  ;;  %v3632_v37 = vld [vmem:[#allocation5 + $0x4d0] sm:$0xf0]  ;;  %v3507_v40 = vor.u32 %v4568_v32, %v3504_v33  ;;  %v4532_v43 = vld [vmem:[#allocation5 + $0x2a4] sm:$0xf] }
  0x55   :  { %1428 = vmatpush.bf16.msra.mxu2 %v3203_v46  ;;  %v3760_v42 = vld [vmem:[#allocation5 + $0x5d0] sm:$0xf0]  ;;  %v3635_v44 = vor.u32 %v4600_v36, %v3632_v37  ;;  %v4564_v47 = vld [vmem:[#allocation5 + $0x3a4] sm:$0xf] }
  0x56   :  { %1416 = vmatpush.bf16.msrb.mxu3 %v3059_v52  ;;  %v3360_v46 = vld [vmem:[#allocation5 + $0x2b0] sm:$0xf0]  ;;  %v4596_v49 = vld [vmem:[#allocation5 + $0x4a4] sm:$0xf]  ;;  %v3763_v52 = vor.u32 %v4632_v41, %v3760_v42 }
  0x57   :  { %1378 = vmatpush.bf16.msrb.mxu0 %v3551_v62  ;;  %v3488_v48 = vld [vmem:[#allocation5 + $0x3b0] sm:$0xf0]  ;;  %v3363_v53 = vor.u32 %v4532_v43, %v3360_v46  ;;  %v4628_v56 = vld [vmem:[#allocation5 + $0x5a4] sm:$0xf] }
  0x58   :  { %1391 = vmatpush.bf16.msrb.mxu1 %v3679_v2  ;;  %v3616_v50 = vld [vmem:[#allocation5 + $0x4b0] sm:$0xf0]  ;;  %v3491_v54 = vor.u32 %v4564_v47, %v3488_v48  ;;  %v4528_v59 = vld [vmem:[#allocation5 + $0x284] sm:$0xf] }
  0x59   :  { %1429 = vmatpush.bf16.msra.mxu2 %v3187_v61  ;;  %v3744_v58 = vld [vmem:[#allocation5 + $0x5b0] sm:$0xf0]  ;;  %v3619_v60 = vor.u32 %v4596_v49, %v3616_v50  ;;  %v4560_v62 = vld [vmem:[#allocation5 + $0x384] sm:$0xf] }
  0x5a   :  { %1417 = vmatpush.bf16.msrb.mxu3 %v3043_v3  ;;  %v3344_v61 = vld [vmem:[#allocation5 + $0x290] sm:$0xf0]  ;;  %v4592_v0 = vld [vmem:[#allocation5 + $0x484] sm:$0xf]  ;;  %v3747_v2 = vor.u32 %v4628_v56, %v3744_v58  ;;  %v3142_v56 = vld [vmem:[#allocation5 + $0xe8] sm:$0xf] }
  0x5b   :  { %1379 = vmatpush.bf16.msrb.mxu0 %v3535_v15  ;;  %v3472_v63 = vld [vmem:[#allocation5 + $0x390] sm:$0xf0]  ;;  %v3347_v3 = vor.u32 %v4528_v59, %v3344_v61  ;;  %v4624_v5 = vld [vmem:[#allocation5 + $0x584] sm:$0xf]  ;;  %v4479_v58 = vld [vmem:[#allocation5 + $0xf4] sm:$0xf0] }
  0x5c   :  { %1392 = vmatpush.bf16.msrb.mxu1 %v3663_v19  ;;  %v3600_v1 = vld [vmem:[#allocation5 + $0x490] sm:$0xf0]  ;;  %v3475_v4 = vor.u32 %v4560_v62, %v3472_v63  ;;  %v4524_v8 = vld [vmem:[#allocation5 + $0x264] sm:$0xf]  ;;  %v3398_v62 = vld [vmem:[#allocation5 + $0x2e8] sm:$0xf] }
  0x5d   :  { %1430 = vmatpush.bf16.msra.mxu2 %v3171_v14  ;;  %v3728_v6 = vld [vmem:[#allocation5 + $0x590] sm:$0xf0]  ;;  %v3603_v9 = vor.u32 %v4592_v0, %v3600_v1  ;;  %v4556_v11 = vld [vmem:[#allocation5 + $0x364] sm:$0xf]  ;;  %v4543_v63 = vld [vmem:[#allocation5 + $0x2f4] sm:$0xf0] }
  0x5e   :  { %1418 = vmatpush.bf16.msrb.mxu3 %v3027_v20  ;;  %1380 = vmatmul.bf16.vlgmr.msrb.gmra.mxu0 %v5079_v30  ;;  %v3328_v10 = vld [vmem:[#allocation5 + $0x270] sm:$0xf0]  ;;  %v4588_v13 = vld [vmem:[#allocation5 + $0x464] sm:$0xf]  ;;  %v3731_v15 = vor.u32 %v4624_v5, %v3728_v6  ;;  %v3143_v5 = vor.u32 %v4479_v58, %v3142_v56  ;;  %v3526_v6 = vld [vmem:[#allocation5 + $0x3e8] sm:$0xf] }
  0x5f   :  { %1437 = vmatpush.bf16.msra.mxu0 %v3395_v24  ;;  %1393 = vmatmul.bf16.vlgmr.msrb.gmra.mxu1 %v5081_v35  ;;  %v3456_v12 = vld [vmem:[#allocation5 + $0x370] sm:$0xf0]  ;;  %v3331_v16 = vor.u32 %v4524_v8, %v3328_v10  ;;  %v4620_v18 = vld [vmem:[#allocation5 + $0x564] sm:$0xf]  ;;  %v4575_v8 = vld [vmem:[#allocation5 + $0x3f4] sm:$0xf0] }
  0x60   :  { %1450 = vmatpush.bf16.msra.mxu1 %v3523_v25  ;;  %v3584_v14 = vld [vmem:[#allocation5 + $0x470] sm:$0xf0]  ;;  %v3459_v17 = vor.u32 %v4556_v11, %v3456_v12  ;;  %v4520_v20 = vld [vmem:[#allocation5 + $0x244] sm:$0xf]  ;;  %v3270_v10 = vld [vmem:[#allocation5 + $0x1e8] sm:$0xf]  ;;  %v3399_v12 = vor.u32 %v4543_v63, %v3398_v62 }
  0x61   :  { %1431 = vmatpush.bf16.msra.mxu2 %v3155_v34  ;;  %1419 = vmatmul.bf16.vlgmr.msrb.gmra.mxu3 %v5065_v55  ;;  %v3712_v19 = vld [vmem:[#allocation5 + $0x570] sm:$0xf0]  ;;  %v3587_v21 = vor.u32 %v4588_v13, %v3584_v14  ;;  %v4552_v23 = vld [vmem:[#allocation5 + $0x344] sm:$0xf]  ;;  %v4511_v11 = vld [vmem:[#allocation5 + $0x1f4] sm:$0xf0] }
  0x62   :  { %1463 = vmatpush.bf16.msra.mxu3 %v3651_v29  ;;  %v3312_v22 = vld [vmem:[#allocation5 + $0x250] sm:$0xf0]  ;;  %v4584_v25 = vld [vmem:[#allocation5 + $0x444] sm:$0xf]  ;;  %v3715_v27 = vor.u32 %v4620_v18, %v3712_v19  ;;  %v3126_v14 = vld [vmem:[#allocation5 + $0xc8] sm:$0xf]  ;;  %v3271_v19 = vor.u32 %v4511_v11, %v3270_v10 }
  0x63   :  { %1438 = vmatpush.bf16.msra.mxu0 %v3379_v39  ;;  %v3440_v24 = vld [vmem:[#allocation5 + $0x350] sm:$0xf0]  ;;  %v3315_v28 = vor.u32 %v4520_v20, %v3312_v22  ;;  %v4616_v31 = vld [vmem:[#allocation5 + $0x544] sm:$0xf]  ;;  %v4539_v18 = vld [vmem:[#allocation5 + $0x2d4] sm:$0xf0] }
  0x64   :  { %1451 = vmatpush.bf16.msra.mxu1 %v3507_v40  ;;  %1432 = vmatmul.bf16.vlgmr.msra.gmra.mxu2 %v5071_v7  ;;  %v3568_v26 = vld [vmem:[#allocation5 + $0x450] sm:$0xf0]  ;;  %v3443_v29 = vor.u32 %v4552_v23, %v3440_v24  ;;  %v4516_v33 = vld [vmem:[#allocation5 + $0x224] sm:$0xf]  ;;  %v3510_v20 = vld [vmem:[#allocation5 + $0x3c8] sm:$0xf] }
  0x65   :  { %1476 = vmatpush.bf16.msrb.mxu2 %v3779_v38  ;;  %v3696_v32 = vld [vmem:[#allocation5 + $0x550] sm:$0xf0]  ;;  %v3571_v34 = vor.u32 %v4584_v25, %v3568_v26  ;;  %v4548_v37 = vld [vmem:[#allocation5 + $0x324] sm:$0xf]  ;;  %v3254_v23 = vld [vmem:[#allocation5 + $0x1c8] sm:$0xf] }
  0x66   :  { %1464 = vmatpush.bf16.msra.mxu3 %v3635_v44  ;;  %v3296_v36 = vld [vmem:[#allocation5 + $0x230] sm:$0xf0]  ;;  %v4580_v39 = vld [vmem:[#allocation5 + $0x424] sm:$0xf]  ;;  %v3699_v41 = vor.u32 %v4616_v31, %v3696_v32  ;;  %v4507_v24 = vld [vmem:[#allocation5 + $0x1d4] sm:$0xf0] }
  0x67   :  { %1439 = vmatpush.bf16.msra.mxu0 %v3363_v53  ;;  %v3424_v38 = vld [vmem:[#allocation5 + $0x330] sm:$0xf0]  ;;  %v4612_v42 = vld [vmem:[#allocation5 + $0x524] sm:$0xf]  ;;  %v3299_v46 = vor.u32 %v4516_v33, %v3296_v36  ;;  %v3110_v26 = vld [vmem:[#allocation5 + $0xa8] sm:$0xf]  ;;  %v3255_v32 = vor.u32 %v4507_v24, %v3254_v23 }
  0x68   :  { %1452 = vmatpush.bf16.msra.mxu1 %v3491_v54  ;;  %v3552_v40 = vld [vmem:[#allocation5 + $0x430] sm:$0xf0]  ;;  %v4512_v44 = vld [vmem:[#allocation5 + $0x204] sm:$0xf]  ;;  %v3427_v47 = vor.u32 %v4548_v37, %v3424_v38  ;;  %v4535_v31 = vld [vmem:[#allocation5 + $0x2b4] sm:$0xf0] }
  0x69   :  { %1477 = vmatpush.bf16.msrb.mxu2 %v3763_v52  ;;  %v3680_v43 = vld [vmem:[#allocation5 + $0x530] sm:$0xf0]  ;;  %v4544_v49 = vld [vmem:[#allocation5 + $0x304] sm:$0xf]  ;;  %v3555_v52 = vor.u32 %v4580_v39, %v3552_v40  ;;  %v3494_v33 = vld [vmem:[#allocation5 + $0x3a8] sm:$0xf] }
  0x6a   :  { %1465 = vmatpush.bf16.msra.mxu3 %v3619_v60  ;;  %v3280_v48 = vld [vmem:[#allocation5 + $0x210] sm:$0xf0]  ;;  %v4576_v53 = vld [vmem:[#allocation5 + $0x404] sm:$0xf]  ;;  %v3683_v60 = vor.u32 %v4612_v42, %v3680_v43  ;;  %v3238_v37 = vld [vmem:[#allocation5 + $0x1a8] sm:$0xf] }
  0x6b   :  { %1440 = vmatpush.bf16.msra.mxu0 %v3347_v3  ;;  %v3408_v50 = vld [vmem:[#allocation5 + $0x310] sm:$0xf0]  ;;  %v4640_v59 = vld [vmem:[#allocation5 + $0x604] sm:$0xf]  ;;  %v3283_v0 = vor.u32 %v4512_v44, %v3280_v48  ;;  %v4503_v38 = vld [vmem:[#allocation5 + $0x1b4] sm:$0xf0] }
  0x6c   :  { %1453 = vmatpush.bf16.msra.mxu1 %v3475_v4  ;;  %v3536_v54 = vld [vmem:[#allocation5 + $0x410] sm:$0xf0]  ;;  %v3411_v1 = vor.u32 %v4544_v49, %v3408_v50  ;;  %v3094_v40 = vld [vmem:[#allocation5 + $0x88] sm:$0xf]  ;;  %v4531_v44 = vld [vmem:[#allocation5 + $0x294] sm:$0xf0] }
  0x6d   :  { %1478 = vmatpush.bf16.msrb.mxu2 %v3747_v2  ;;  %v3792_v61 = vld [vmem:[#allocation5 + $0x610] sm:$0xf0]  ;;  %v4608_v2 = vld [vmem:[#allocation5 + $0x504] sm:$0xf]  ;;  %v3539_v4 = vor.u32 %v4576_v53, %v3536_v54  ;;  %v3350_v43 = vld [vmem:[#allocation5 + $0x288] sm:$0xf] }
  0x6e   :  { %1466 = vmatpush.bf16.msra.mxu3 %v3603_v9  ;;  %v3664_v3 = vld [vmem:[#allocation5 + $0x510] sm:$0xf0]  ;;  %v3795_v9 = vor.u32 %v4640_v59, %v3792_v61  ;;  %v4563_v48 = vld [vmem:[#allocation5 + $0x394] sm:$0xf0]  ;;  %v3222_v50 = vld [vmem:[#allocation5 + $0x188] sm:$0xf]  ;;  %v3351_v53 = vor.u32 %v4531_v44, %v3350_v43 }
  0x6f   :  { %1441 = vmatpush.bf16.msra.mxu0 %v3331_v16  ;;  %v3667_v13 = vor.u32 %v4608_v2, %v3664_v3  ;;  %v3527_v16 = vor.u32 %v4575_v8, %v3526_v6  ;;  %v3078_v54 = vld [vmem:[#allocation5 + $0x68] sm:$0xf]  ;;  %v4463_v56 = vld [vmem:[#allocation5 + $0x74] sm:$0xf0] }
  0x70   :  { %1454 = vmatpush.bf16.msra.mxu1 %v3459_v17  ;;  %v3382_v17 = vld [vmem:[#allocation5 + $0x2c8] sm:$0xf]  ;;  %v4559_v63 = vld [vmem:[#allocation5 + $0x374] sm:$0xf0] }
  0x71   :  { %1479 = vmatpush.bf16.msrb.mxu2 %v3731_v15  ;;  %v4475_v15 = vld [vmem:[#allocation5 + $0xd4] sm:$0xf0]  ;;  %v3383_v25 = vor.u32 %v4539_v18, %v3382_v17  ;;  %v3334_v59 = vld [vmem:[#allocation5 + $0x268] sm:$0xf] }
  0x72   :  { %1467 = vmatpush.bf16.msra.mxu3 %v3587_v21  ;;  %v4571_v21 = vld [vmem:[#allocation5 + $0x3d4] sm:$0xf0]  ;;  %v3127_v22 = vor.u32 %v4475_v15, %v3126_v14  ;;  %v3462_v62 = vld [vmem:[#allocation5 + $0x368] sm:$0xf] }
  0x73   :  { %1442 = vmatpush.bf16.msra.mxu0 %v3315_v28  ;;  %v3511_v28 = vor.u32 %v4571_v21, %v3510_v20  ;;  %v4495_v2 = vld [vmem:[#allocation5 + $0x174] sm:$0xf0]  ;;  %v3463_v6 = vor.u32 %v4559_v63, %v3462_v62  ;;  %v3318_v8 = vld [vmem:[#allocation5 + $0x248] sm:$0xf] }
  0x74   :  { %1455 = vmatpush.bf16.msra.mxu1 %v3443_v29  ;;  %v3366_v29 = vld [vmem:[#allocation5 + $0x2a8] sm:$0xf]  ;;  %v4491_v15 = vld [vmem:[#allocation5 + $0x154] sm:$0xf0] }
  0x75   :  { %1480 = vmatpush.bf16.msrb.mxu2 %v3715_v27  ;;  %v4471_v27 = vld [vmem:[#allocation5 + $0xb4] sm:$0xf0]  ;;  %v3367_v39 = vor.u32 %v4535_v31, %v3366_v29  ;;  %v3446_v11 = vld [vmem:[#allocation5 + $0x348] sm:$0xf] }
  0x76   :  { %1468 = vmatpush.bf16.msra.mxu3 %v3571_v34  ;;  %v4567_v34 = vld [vmem:[#allocation5 + $0x3b4] sm:$0xf0]  ;;  %v3111_v36 = vor.u32 %v4471_v27, %v3110_v26  ;;  %v3190_v14 = vld [vmem:[#allocation5 + $0x148] sm:$0xf] }
  0x77   :  { %1443 = vmatpush.bf16.msra.mxu0 %v3299_v46  ;;  %v3495_v42 = vor.u32 %v4567_v34, %v3494_v33  ;;  %v3239_v46 = vor.u32 %v4503_v38, %v3238_v37  ;;  %v3046_v17 = vld [vmem:[#allocation5 + $0x28] sm:$0xf]  ;;  %v4455_v18 = vld [vmem:[#allocation5 + $0x34] sm:$0xf0] }
  0x78   :  { %1456 = vmatpush.bf16.msra.mxu1 %v3427_v47  ;;  %v3478_v47 = vld [vmem:[#allocation5 + $0x388] sm:$0xf]  ;;  %v4519_v21 = vld [vmem:[#allocation5 + $0x234] sm:$0xf0] }
  0x79   :  { %1481 = vmatpush.bf16.msrb.mxu2 %v3699_v41  ;;  %v4467_v41 = vld [vmem:[#allocation5 + $0x94] sm:$0xf0]  ;;  %v3479_v58 = vor.u32 %v4563_v48, %v3478_v47  ;;  %v3302_v20 = vld [vmem:[#allocation5 + $0x228] sm:$0xf]  ;;  %v4477_v47 = vld [vmem:[#allocation5 + $0xec] sm:$0xf] }
  0x7a   :  { %1469 = vmatpush.bf16.msra.mxu3 %v3555_v52  ;;  %v3095_v49 = vor.u32 %v4467_v41, %v3094_v40  ;;  %v4499_v52 = vld [vmem:[#allocation5 + $0x194] sm:$0xf0]  ;;  %v3430_v23 = vld [vmem:[#allocation5 + $0x328] sm:$0xf]  ;;  %v3303_v29 = vor.u32 %v4519_v21, %v3302_v20  ;;  %v3144_v48 = vld [vmem:[#allocation5 + $0xf8] sm:$0xf0] }
  0x7b   :  { %1444 = vmatpush.bf16.msra.mxu0 %v3283_v0  ;;  %v3223_v61 = vor.u32 %v4499_v52, %v3222_v50  ;;  %v3079_v0 = vor.u32 %v4463_v56, %v3078_v54  ;;  %v4551_v24 = vld [vmem:[#allocation5 + $0x334] sm:$0xf0]  ;;  %v3174_v26 = vld [vmem:[#allocation5 + $0x128] sm:$0xf]  ;;  %v3147_v63 = vor.u32 %v4477_v47, %v3144_v48 }
  0x7c   :  { %1457 = vmatpush.bf16.msra.mxu1 %v3411_v1  ;;  %v3206_v1 = vld [vmem:[#allocation5 + $0x168] sm:$0xf]  ;;  %v4487_v27 = vld [vmem:[#allocation5 + $0x134] sm:$0xf0]  ;;  %v3431_v34 = vor.u32 %v4551_v24, %v3430_v23  ;;  %v3240_v23 = vld [vmem:[#allocation5 + $0x1b8] sm:$0xf0] }
  0x7d   :  { %1482 = vmatpush.bf16.msrb.mxu2 %v3683_v60  ;;  %v4527_v60 = vld [vmem:[#allocation5 + $0x274] sm:$0xf0]  ;;  %v3207_v10 = vor.u32 %v4495_v2, %v3206_v1  ;;  %v3286_v37 = vld [vmem:[#allocation5 + $0x208] sm:$0xf]  ;;  %v3175_v40 = vor.u32 %v4487_v27, %v3174_v26  ;;  %v4473_v1 = vld [vmem:[#allocation5 + $0xcc] sm:$0xf] }
  0x7e   :  { %1470 = vmatpush.bf16.msra.mxu3 %v3539_v4  ;;  %1445 = vmatmul.bf16.vlgmr.msra.gmra.mxu0 %v5063_v51  ;;  %v3335_v3 = vor.u32 %v4527_v60, %v3334_v59  ;;  %v3062_v4 = vld [vmem:[#allocation5 + $0x48] sm:$0xf]  ;;  %v4451_v31 = vld [vmem:[#allocation5 + $0x14] sm:$0xf0]  ;;  %v4509_v60 = vld [vmem:[#allocation5 + $0x1ec] sm:$0xf] }
  0x7f   :  { %1528 = vmatpush.bf16.msrb.mxu0 %v3399_v12  ;;  %1458 = vmatmul.bf16.vlgmr.msra.gmra.mxu1 %v5067_v57  ;;  %v4555_v12 = vld [vmem:[#allocation5 + $0x354] sm:$0xf0]  ;;  %v3782_v52 = vld [vmem:[#allocation5 + $0x5e8] sm:$0xf]  ;;  %v3128_v2 = vld [vmem:[#allocation5 + $0xd8] sm:$0xf0] }
  0x80   :  { %1502 = vmatpush.bf16.msrb.mxu1 %v3143_v5  ;;  %v4459_v5 = vld [vmem:[#allocation5 + $0x54] sm:$0xf0]  ;;  %v3638_v54 = vld [vmem:[#allocation5 + $0x4c8] sm:$0xf]  ;;  %v4465_v26 = vld [vmem:[#allocation5 + $0x8c] sm:$0xf] }
  0x81   :  { %1483 = vmatpush.bf16.msrb.mxu2 %v3667_v13  ;;  %1471 = vmatmul.bf16.vlgmr.msra.gmra.mxu3 %v5079_v30  ;;  %v3063_v13 = vor.u32 %v4459_v5, %v3062_v4  ;;  %v4607_v33 = vld [vmem:[#allocation5 + $0x4f4] sm:$0xf0]  ;;  %v3766_v5 = vld [vmem:[#allocation5 + $0x5c8] sm:$0xf]  ;;  %v3096_v27 = vld [vmem:[#allocation5 + $0x98] sm:$0xf0] }
  0x82   :  { %1496 = vmatpush.bf16.msrb.mxu3 %v3795_v9  ;;  %v4523_v9 = vld [vmem:[#allocation5 + $0x254] sm:$0xf0]  ;;  %v3606_v20 = vld [vmem:[#allocation5 + $0x488] sm:$0xf] }
  0x83   :  { %1529 = vmatpush.bf16.msrb.mxu0 %v3383_v25  ;;  %v3047_v25 = vor.u32 %v4455_v18, %v3046_v17  ;;  %v4515_v38 = vld [vmem:[#allocation5 + $0x214] sm:$0xf0]  ;;  %v3750_v18 = vld [vmem:[#allocation5 + $0x5a8] sm:$0xf] }
  0x84   :  { %1503 = vmatpush.bf16.msrb.mxu1 %v3127_v22  ;;  %1484 = vmatmul.bf16.vlgmr.msrb.gmra.mxu2 %v5081_v35  ;;  %v3191_v22 = vor.u32 %v4491_v15, %v3190_v14  ;;  %v4547_v41 = vld [vmem:[#allocation5 + $0x314] sm:$0xf0]  ;;  %v3287_v50 = vor.u32 %v4515_v38, %v3286_v37  ;;  %v4469_v14 = vld [vmem:[#allocation5 + $0xac] sm:$0xf]  ;;  %v3112_v15 = vld [vmem:[#allocation5 + $0xb8] sm:$0xf0]  ;;  %v3099_v38 = vor.u32 %v4465_v26, %v3096_v27 }
  0x85   :  { %1541 = vmatpush.bf16.msra.mxu2 %v3527_v16  ;;  %v3319_v16 = vor.u32 %v4523_v9, %v3318_v8  ;;  %v4643_v43 = vld [vmem:[#allocation5 + $0x614] sm:$0xf0]  ;;  %v3622_v8 = vld [vmem:[#allocation5 + $0x4a8] sm:$0xf]  ;;  %v3115_v24 = vor.u32 %v4469_v14, %v3112_v15  ;;  %v3224_v37 = vld [vmem:[#allocation5 + $0x198] sm:$0xf0] }
  0x86   :  { %1515 = vmatpush.bf16.msra.mxu3 %v3271_v19  ;;  %v3447_v19 = vor.u32 %v4555_v12, %v3446_v11  ;;  %v4599_v9 = vld [vmem:[#allocation5 + $0x4b4] sm:$0xf0]  ;;  %v3256_v11 = vld [vmem:[#allocation5 + $0x1d8] sm:$0xf0]  ;;  %v3131_v12 = vor.u32 %v4473_v1, %v3128_v2  ;;  %v3574_v47 = vld [vmem:[#allocation5 + $0x448] sm:$0xf] }
  0x87   :  { %1530 = vmatpush.bf16.msrb.mxu0 %v3367_v39  ;;  %v3414_v39 = vld [vmem:[#allocation5 + $0x308] sm:$0xf]  ;;  %v4595_v21 = vld [vmem:[#allocation5 + $0x494] sm:$0xf0]  ;;  %v3192_v1 = vld [vmem:[#allocation5 + $0x158] sm:$0xf0] }
  0x88   :  { %1504 = vmatpush.bf16.msrb.mxu1 %v3111_v36  ;;  %v3158_v36 = vld [vmem:[#allocation5 + $0x108] sm:$0xf]  ;;  %v3415_v56 = vor.u32 %v4547_v41, %v3414_v39  ;;  %v3080_v41 = vld [vmem:[#allocation5 + $0x78] sm:$0xf0]  ;;  %v4587_v48 = vld [vmem:[#allocation5 + $0x454] sm:$0xf0] }
  0x89   :  { %1542 = vmatpush.bf16.msra.mxu2 %v3511_v28  ;;  %v3030_v28 = vld [vmem:[#allocation5 + $0x8] sm:$0xf]  ;;  %v3176_v14 = vld [vmem:[#allocation5 + $0x138] sm:$0xf0] }
  0x8a   :  { %1516 = vmatpush.bf16.msra.mxu3 %v3255_v32  ;;  %v3654_v32 = vld [vmem:[#allocation5 + $0x4e8] sm:$0xf]  ;;  %v3031_v44 = vor.u32 %v4451_v31, %v3030_v28  ;;  %v3607_v28 = vor.u32 %v4595_v21, %v3606_v20  ;;  %v4449_v20 = vld [vmem:[#allocation5 + $0xc] sm:$0xf]  ;;  %v3032_v21 = vld [vmem:[#allocation5 + $0x18] sm:$0xf0] }
  0x8b   :  { %1531 = vmatpush.bf16.msrb.mxu0 %v3351_v53  ;;  %v4639_v53 = vld [vmem:[#allocation5 + $0x5f4] sm:$0xf0]  ;;  %v3734_v31 = vld [vmem:[#allocation5 + $0x588] sm:$0xf]  ;;  %v3528_v26 = vld [vmem:[#allocation5 + $0x3f8] sm:$0xf0] }
  0x8c   :  { %1505 = vmatpush.bf16.msrb.mxu1 %v3095_v49  ;;  %v3655_v49 = vor.u32 %v4607_v33, %v3654_v32  ;;  %v4627_v32 = vld [vmem:[#allocation5 + $0x594] sm:$0xf0]  ;;  %v3590_v33 = vld [vmem:[#allocation5 + $0x468] sm:$0xf] }
  0x8d   :  { %1543 = vmatpush.bf16.msra.mxu2 %v3495_v42  ;;  %v3798_v42 = vld [vmem:[#allocation5 + $0x608] sm:$0xf]  ;;  %v3735_v39 = vor.u32 %v4627_v32, %v3734_v31  ;;  %v4537_v31 = vld [vmem:[#allocation5 + $0x2cc] sm:$0xf]  ;;  %v3035_v32 = vor.u32 %v4449_v20, %v3032_v21 }
  0x8e   :  { %1517 = vmatpush.bf16.msra.mxu3 %v3239_v46  ;;  %v4483_v46 = vld [vmem:[#allocation5 + $0x114] sm:$0xf0]  ;;  %v3799_v59 = vor.u32 %v4643_v43, %v3798_v42  ;;  %v4557_v20 = vld [vmem:[#allocation5 + $0x36c] sm:$0xf] }
  0x8f   :  { %1532 = vmatpush.bf16.msrb.mxu0 %v3335_v3  ;;  %v3159_v62 = vor.u32 %v4483_v46, %v3158_v36  ;;  %v4497_v36 = vld [vmem:[#allocation5 + $0x18c] sm:$0xf]  ;;  %v4623_v46 = vld [vmem:[#allocation5 + $0x574] sm:$0xf0] }
  0x90   :  { %1506 = vmatpush.bf16.msrb.mxu1 %v3079_v0  ;;  %v3783_v0 = vor.u32 %v4639_v53, %v3782_v52  ;;  %v3227_v43 = vor.u32 %v4497_v36, %v3224_v37  ;;  %v3160_v36 = vld [vmem:[#allocation5 + $0x118] sm:$0xf0] }
  0x91   :  { %1544 = vmatpush.bf16.msra.mxu2 %v3479_v58  ;;  %3805 = vmatmul.msk.bf16.vlgmr.msrb.gmra.mxu3 %vm1316_vm0, %v5075_v45  ;;  %v4603_v58 = vld [vmem:[#allocation5 + $0x4d4] sm:$0xf0] }
  0x92   :  { %1518 = vmatpush.bf16.msra.mxu3 %v3223_v61  ;;  %v3272_v61 = vld [vmem:[#allocation5 + $0x1f8] sm:$0xf0]  ;;  %v3639_v3 = vor.u32 %v4603_v58, %v3638_v54  ;;  %v4457_v54 = vld [vmem:[#allocation5 + $0x4c] sm:$0xf]  ;;  %v3575_v58 = vor.u32 %v4587_v48, %v3574_v47 }
  0x93   :  { %1533 = vmatpush.bf16.msrb.mxu0 %v3319_v16  ;;  %v3275_v4 = vor.u32 %v4509_v60, %v3272_v61  ;;  %v3623_v16 = vor.u32 %v4599_v9, %v3622_v8  ;;  %v3702_v60 = vld [vmem:[#allocation5 + $0x548] sm:$0xf]  ;;  %v4619_v61 = vld [vmem:[#allocation5 + $0x554] sm:$0xf0]  ;;  %v4601_v47 = vld [vmem:[#allocation5 + $0x4cc] sm:$0xf] }
  0x94   :  { %1507 = vmatpush.bf16.msrb.mxu1 %v3063_v13  ;;  %v3686_v9 = vld [vmem:[#allocation5 + $0x528] sm:$0xf]  ;;  %v3640_v48 = vld [vmem:[#allocation5 + $0x4d8] sm:$0xf0] }
  0x95   :  { %1545 = vmatpush.bf16.msra.mxu2 %v3463_v6  ;;  %v4635_v6 = vld [vmem:[#allocation5 + $0x5d4] sm:$0xf0] }
  0x96   :  { %1519 = vmatpush.bf16.msra.mxu3 %v3207_v10  ;;  %v4505_v10 = vld [vmem:[#allocation5 + $0x1cc] sm:$0xf]  ;;  %v3767_v13 = vor.u32 %v4635_v6, %v3766_v5  ;;  %v3048_v5 = vld [vmem:[#allocation5 + $0x38] sm:$0xf0] }
  0x97   :  { %1534 = vmatpush.bf16.msrb.mxu0 %v3303_v29  ;;  %v3259_v17 = vor.u32 %v4505_v10, %v3256_v11  ;;  %v4615_v10 = vld [vmem:[#allocation5 + $0x534] sm:$0xf0]  ;;  %v3542_v11 = vld [vmem:[#allocation5 + $0x408] sm:$0xf] }
  0x98   :  { %1508 = vmatpush.bf16.msrb.mxu1 %v3047_v25 }
  0x99   :  { %1546 = vmatpush.bf16.msra.mxu2 %v3447_v19  ;;  %v4631_v19 = vld [vmem:[#allocation5 + $0x5b4] sm:$0xf0] }
  0x9a   :  { %1520 = vmatpush.bf16.msra.mxu3 %v3191_v22  ;;  %v4501_v22 = vld [vmem:[#allocation5 + $0x1ac] sm:$0xf]  ;;  %v3751_v25 = vor.u32 %v4631_v19, %v3750_v18  ;;  %v3687_v18 = vor.u32 %v4615_v10, %v3686_v9  ;;  %v3670_v19 = vld [vmem:[#allocation5 + $0x508] sm:$0xf]  ;;  %v3480_v10 = vld [vmem:[#allocation5 + $0x398] sm:$0xf0] }
  0x9b   :  { %1535 = vmatpush.bf16.msrb.mxu0 %v3287_v50  ;;  %v3243_v29 = vor.u32 %v4501_v22, %v3240_v23  ;;  %v3208_v50 = vld [vmem:[#allocation5 + $0x178] sm:$0xf0] }
  0x9c   :  { %1509 = vmatpush.bf16.msrb.mxu1 %v3031_v44  ;;  %v3718_v44 = vld [vmem:[#allocation5 + $0x568] sm:$0xf] }
  0x9d   :  { %1547 = vmatpush.bf16.msra.mxu2 %v3431_v34  ;;  %v4591_v34 = vld [vmem:[#allocation5 + $0x474] sm:$0xf0]  ;;  %v3719_v53 = vor.u32 %v4623_v46, %v3718_v44  ;;  %v3512_v46 = vld [vmem:[#allocation5 + $0x3d8] sm:$0xf0] }
  0x9e   :  { %1521 = vmatpush.bf16.msra.mxu3 %v3175_v40  ;;  %1536 = vmatmul.bf16.vlgmr.msrb.gmra.mxu0 %v5063_v51  ;;  %v4461_v40 = vld [vmem:[#allocation5 + $0x6c] sm:$0xf]  ;;  %v3591_v42 = vor.u32 %v4591_v34, %v3590_v33  ;;  %v3384_v33 = vld [vmem:[#allocation5 + $0x2d8] sm:$0xf0] }
  0x9f   :  { %1587 = vmatpush.bf16.msra.mxu0 %v3799_v59  ;;  %1510 = vmatmul.bf16.vlgmr.msrb.gmra.mxu1 %v5065_v55  ;;  %v3083_v52 = vor.u32 %v4461_v40, %v3080_v41  ;;  %v4481_v34 = vld [vmem:[#allocation5 + $0x10c] sm:$0xf] }
  0xa0   :  { %1554 = vmatpush.bf16.msra.mxu1 %v3655_v49  ;;  %v4493_v49 = vld [vmem:[#allocation5 + $0x16c] sm:$0xf]  ;;  %v3163_v44 = vor.u32 %v4481_v34, %v3160_v36 }
  0xa1   :  { %1548 = vmatpush.bf16.msra.mxu2 %v3415_v56  ;;  %v3064_v56 = vld [vmem:[#allocation5 + $0x58] sm:$0xf0]  ;;  %v3211_v59 = vor.u32 %v4493_v49, %v3208_v50  ;;  %v4533_v50 = vld [vmem:[#allocation5 + $0x2ac] sm:$0xf] }
  0xa2   :  { %1522 = vmatpush.bf16.msra.mxu3 %v3159_v62  ;;  %v3558_v62 = vld [vmem:[#allocation5 + $0x428] sm:$0xf]  ;;  %v3067_v2 = vor.u32 %v4457_v54, %v3064_v56  ;;  %v3768_v54 = vld [vmem:[#allocation5 + $0x5d8] sm:$0xf0]  ;;  %v4553_v34 = vld [vmem:[#allocation5 + $0x34c] sm:$0xf] }
  0xa3   :  { %1606 = vmatpush.bf16.msrb.mxu0 %v3275_v4  ;;  %v4453_v4 = vld [vmem:[#allocation5 + $0x2c] sm:$0xf] }
  0xa4   :  { %1555 = vmatpush.bf16.msra.mxu1 %v3639_v3  ;;  %1549 = vmatmul.bf16.vlgmr.msra.gmra.mxu2 %v5067_v57  ;;  %v3703_v3 = vor.u32 %v4619_v61, %v3702_v60  ;;  %v3051_v15 = vor.u32 %v4453_v4, %v3048_v5  ;;  %v3496_v61 = vld [vmem:[#allocation5 + $0x3b8] sm:$0xf0] }
  0xa5   :  { %1593 = vmatpush.bf16.msrb.mxu2 %v3147_v63  ;;  %1523 = vmatmul.bf16.vlgmr.msra.gmra.mxu3 %v5071_v7  ;;  %v4583_v63 = vld [vmem:[#allocation5 + $0x434] sm:$0xf0]  ;;  %v3752_v4 = vld [vmem:[#allocation5 + $0x5b8] sm:$0xf0] }
  0xa6   :  { %1567 = vmatpush.bf16.msrb.mxu3 %v3783_v0  ;;  %v4489_v0 = vld [vmem:[#allocation5 + $0x14c] sm:$0xf]  ;;  %v3559_v6 = vor.u32 %v4583_v63, %v3558_v62  ;;  %v3624_v63 = vld [vmem:[#allocation5 + $0x4b8] sm:$0xf0] }
  0xa7   :  { %1607 = vmatpush.bf16.msrb.mxu0 %v3259_v17  ;;  %v3195_v8 = vor.u32 %v4489_v0, %v3192_v1  ;;  %v3400_v17 = vld [vmem:[#allocation5 + $0x2f8] sm:$0xf0]  ;;  %v4597_v62 = vld [vmem:[#allocation5 + $0x4ac] sm:$0xf] }
  0xa8   :  { %1556 = vmatpush.bf16.msra.mxu1 %v3623_v16  ;;  %v4541_v16 = vld [vmem:[#allocation5 + $0x2ec] sm:$0xf] }
  0xa9   :  { %1594 = vmatpush.bf16.msrb.mxu2 %v3131_v12  ;;  %v4579_v12 = vld [vmem:[#allocation5 + $0x414] sm:$0xf0]  ;;  %v3403_v27 = vor.u32 %v4541_v16, %v3400_v17  ;;  %v4529_v1 = vld [vmem:[#allocation5 + $0x28c] sm:$0xf]  ;;  %v3736_v17 = vld [vmem:[#allocation5 + $0x598] sm:$0xf0] }
  0xaa   :  { %1568 = vmatpush.bf16.msrb.mxu3 %v3767_v13  ;;  %v4485_v13 = vld [vmem:[#allocation5 + $0x12c] sm:$0xf]  ;;  %v3543_v22 = vor.u32 %v4579_v12, %v3542_v11  ;;  %v3608_v12 = vld [vmem:[#allocation5 + $0x498] sm:$0xf0] }
  0xab   :  { %1608 = vmatpush.bf16.msrb.mxu0 %v3243_v29  ;;  %v3179_v23 = vor.u32 %v4485_v13, %v3176_v14  ;;  %v3656_v29 = vld [vmem:[#allocation5 + $0x4f8] sm:$0xf0]  ;;  %v4593_v11 = vld [vmem:[#allocation5 + $0x48c] sm:$0xf] }
  0xac   :  { %1557 = vmatpush.bf16.msra.mxu1 %v3607_v28  ;;  %v4605_v28 = vld [vmem:[#allocation5 + $0x4ec] sm:$0xf] }
  0xad   :  { %1595 = vmatpush.bf16.msrb.mxu2 %v3115_v24  ;;  %v4611_v24 = vld [vmem:[#allocation5 + $0x514] sm:$0xf0]  ;;  %v3659_v41 = vor.u32 %v4605_v28, %v3656_v29  ;;  %v4525_v14 = vld [vmem:[#allocation5 + $0x26c] sm:$0xf]  ;;  %v3720_v29 = vld [vmem:[#allocation5 + $0x578] sm:$0xf0] }
  0xae   :  { %1569 = vmatpush.bf16.msrb.mxu3 %v3751_v25  ;;  %3806 = vmatmul.msk.bf16.vlgmr.msra.gmra.mxu0 %vm1316_vm0, %v5075_v45  ;;  %v4573_v25 = vld [vmem:[#allocation5 + $0x3ec] sm:$0xf]  ;;  %v3671_v37 = vor.u32 %v4611_v24, %v3670_v19  ;;  %v3611_v19 = vor.u32 %v4593_v11, %v3608_v12  ;;  %v3592_v24 = vld [vmem:[#allocation5 + $0x478] sm:$0xf0] }
  0xaf   :  { %1609 = vmatpush.bf16.msrb.mxu0 %v3227_v43  ;;  %v3531_v40 = vor.u32 %v4573_v25, %v3528_v26  ;;  %v3387_v43 = vor.u32 %v4537_v31, %v3384_v33  ;;  %v4521_v26 = vld [vmem:[#allocation5 + $0x24c] sm:$0xf]  ;;  %v3544_v11 = vld [vmem:[#allocation5 + $0x418] sm:$0xf0] }
  0xb0   :  { %1558 = vmatpush.bf16.msra.mxu1 %v3591_v42  ;;  %v4569_v42 = vld [vmem:[#allocation5 + $0x3cc] sm:$0xf] }
  0xb1   :  { %1596 = vmatpush.bf16.msrb.mxu2 %v3099_v38  ;;  %v4637_v38 = vld [vmem:[#allocation5 + $0x5ec] sm:$0xf]  ;;  %v3515_v56 = vor.u32 %v4569_v42, %v3512_v46 }
  0xb2   :  { %1570 = vmatpush.bf16.msrb.mxu3 %v3735_v39  ;;  %v3784_v39 = vld [vmem:[#allocation5 + $0x5f8] sm:$0xf0]  ;;  %v4621_v28 = vld [vmem:[#allocation5 + $0x56c] sm:$0xf] }
  0xb3   :  { %1610 = vmatpush.bf16.msrb.mxu0 %v3211_v59  ;;  %v3787_v49 = vor.u32 %v4637_v38, %v3784_v39  ;;  %v4565_v59 = vld [vmem:[#allocation5 + $0x3ac] sm:$0xf]  ;;  %v3448_v38 = vld [vmem:[#allocation5 + $0x358] sm:$0xf0] }
  0xb4   :  { %1559 = vmatpush.bf16.msra.mxu1 %v3575_v58  ;;  %v3643_v58 = vor.u32 %v4601_v47, %v3640_v48  ;;  %v3499_v5 = vor.u32 %v4565_v59, %v3496_v61  ;;  %v4585_v39 = vld [vmem:[#allocation5 + $0x44c] sm:$0xf]  ;;  %v3704_v47 = vld [vmem:[#allocation5 + $0x558] sm:$0xf0]  ;;  %v3451_v48 = vor.u32 %v4553_v34, %v3448_v38  ;;  %v3890_v38 = vld [vmem:[#allocation8 + $0xa0] sm:$0xf] }
  0xb5   :  { %1597 = vmatpush.bf16.msrb.mxu2 %v3083_v52  ;;  %v3368_v52 = vld [vmem:[#allocation5 + $0x2b8] sm:$0xf0]  ;;  %v4517_v42 = vld [vmem:[#allocation5 + $0x22c] sm:$0xf] }
  0xb6   :  { %1571 = vmatpush.bf16.msrb.mxu3 %v3719_v53  ;;  %v4633_v53 = vld [vmem:[#allocation5 + $0x5cc] sm:$0xf]  ;;  %v3371_v60 = vor.u32 %v4533_v50, %v3368_v52 }
  0xb7   :  { %1611 = vmatpush.bf16.msrb.mxu0 %v3195_v8  ;;  %v3771_v0 = vor.u32 %v4633_v53, %v3768_v54  ;;  %v4561_v8 = vld [vmem:[#allocation5 + $0x38c] sm:$0xf]  ;;  %v3432_v53 = vld [vmem:[#allocation5 + $0x338] sm:$0xf0] }
  0xb8   :  { %1560 = vmatpush.bf16.msra.mxu1 %v3559_v6  ;;  %v3627_v6 = vor.u32 %v4597_v62, %v3624_v63  ;;  %v4617_v46 = vld [vmem:[#allocation5 + $0x54c] sm:$0xf]  ;;  %v3688_v63 = vld [vmem:[#allocation5 + $0x538] sm:$0xf0] }
  0xb9   :  { %1598 = vmatpush.bf16.msrb.mxu2 %v3067_v2  ;;  %v3352_v2 = vld [vmem:[#allocation5 + $0x298] sm:$0xf0]  ;;  %v4549_v50 = vld [vmem:[#allocation5 + $0x32c] sm:$0xf] }
  0xba   :  { %1572 = vmatpush.bf16.msrb.mxu3 %v3703_v3  ;;  %v4629_v3 = vld [vmem:[#allocation5 + $0x5ac] sm:$0xf]  ;;  %v3355_v9 = vor.u32 %v4529_v1, %v3352_v2  ;;  %v3800_v1 = vld [vmem:[#allocation5 + $0x618] sm:$0xf0]  ;;  %v5111_v2 = vld [vmem:[#allocation7] sm:$0xf] }
  0xbb   :  { %1612 = vmatpush.bf16.msrb.mxu0 %v3179_v23  ;;  %v3755_v13 = vor.u32 %v4629_v3, %v3752_v4  ;;  %v5103_v16 = vpop.f32.mrf.mxu0  ;;  %v4589_v23 = vld [vmem:[#allocation5 + $0x46c] sm:$0xf]  ;;  %v3435_v4 = vor.u32 %v4549_v50, %v3432_v53 }
  0xbc   :  { %1561 = vmatpush.bf16.msra.mxu1 %v3543_v22  ;;  %v3464_v22 = vld [vmem:[#allocation5 + $0x378] sm:$0xf0]  ;;  %v3595_v33 = vor.u32 %v4589_v23, %v3592_v24  ;;  %v4581_v54 = vld [vmem:[#allocation5 + $0x42c] sm:$0xf] }
  0xbd   :  { %1599 = vmatpush.bf16.msrb.mxu2 %v3051_v15  ;;  %v3336_v15 = vld [vmem:[#allocation5 + $0x278] sm:$0xf0]  ;;  %v4513_v59 = vld [vmem:[#allocation5 + $0x20c] sm:$0xf] }
  0xbe   :  { %1573 = vmatpush.bf16.msrb.mxu3 %v3687_v18  ;;  %v3483_v18 = vor.u32 %v4561_v8, %v3480_v10  ;;  %v3339_v21 = vor.u32 %v4525_v14, %v3336_v15  ;;  %v4613_v61 = vld [vmem:[#allocation5 + $0x52c] sm:$0xf]  ;;  %v3922_v14 = vld [vmem:[#allocation8 + $0xe0] sm:$0xf]  ;;  %v4674_v15 = vld [vmem:[#allocation8 + $0xec] sm:$0xf0] }
  0xbf   :  { %1562 = vmatmul.bf16.vlgmr.msra.gmra.mxu1 %v5079_v30  ;;  %1613 = vmatpush.bf16.msrb.mxu0 %v3163_v44  ;;  %v4577_v10 = vld [vmem:[#allocation5 + $0x40c] sm:$0xf]  ;;  %v3923_v24 = vor.u32 %v4674_v15, %v3922_v14  ;;  %v3810_v14 = vld [vmem:[#allocation8] sm:$0xf]  ;;  %v4646_v15 = vld [vmem:[#allocation8 + $0xc] sm:$0xf0] }
  0xc0   :  { %1619 = vmatpush.bf16.msrb.mxu1 %v3403_v27  ;;  %v3320_v27 = vld [vmem:[#allocation5 + $0x258] sm:$0xf0]  ;;  %v3547_v23 = vor.u32 %v4577_v10, %v3544_v11  ;;  %v3954_v11 = vld [vmem:[#allocation8 + $0x120] sm:$0xf] }
  0xc1   :  { %1600 = vmatpush.bf16.msrb.mxu2 %v3035_v32  ;;  %v3467_v32 = vor.u32 %v4557_v20, %v3464_v22  ;;  %v3323_v36 = vor.u32 %v4521_v26, %v3320_v27  ;;  %v4706_v20 = vld [vmem:[#allocation8 + $0x1ec] sm:$0xf0]  ;;  %v3906_v26 = vld [vmem:[#allocation8 + $0xc0] sm:$0xf] }
  0xc2   :  { %1574 = vmatpush.bf16.msrb.mxu3 %v3671_v37  ;;  %1614 = vmatmul.bf16.vlgmr.msrb.gmra.mxu0 %v5071_v7  ;;  %v5105_v25 = vpop.f32.mrf.mxu1  ;;  %v4670_v27 = vld [vmem:[#allocation8 + $0xcc] sm:$0xf0] }
  0xc3   :  { %1658 = vmatpush.bf16.msra.mxu0 %v3787_v49  ;;  %v5107_v31 = vpop.f32.mrf.mxu2  ;;  %v1331_v44 = vpop.f32.mrf.mxu0 }
  0xc4   :  { %1620 = vmatpush.bf16.msrb.mxu1 %v3387_v43  ;;  %1601 = vmatmul.bf16.vlgmr.msrb.gmra.mxu2 %v5065_v55  ;;  %v4625_v55 = vld [vmem:[#allocation5 + $0x58c] sm:$0xf]  ;;  %v3304_v43 = vld [vmem:[#allocation5 + $0x238] sm:$0xf0]  ;;  %v4662_v44 = vld [vmem:[#allocation8 + $0x8c] sm:$0xf0] }
  0xc5   :  { %1645 = vmatpush.bf16.msra.mxu2 %v3659_v41  ;;  %1575 = vmatmul.bf16.vlgmr.msrb.gmra.mxu3 %v5081_v35  ;;  %v3739_v7 = vor.u32 %v4625_v55, %v3736_v17  ;;  %v3723_v41 = vor.u32 %v4621_v28, %v3720_v29  ;;  %v3307_v52 = vor.u32 %v4517_v42, %v3304_v43  ;;  %v4609_v55 = vld [vmem:[#allocation5 + $0x50c] sm:$0xf]  ;;  %v4034_v29 = vld [vmem:[#allocation8 + $0x1c0] sm:$0xf]  ;;  %v4698_v42 = vld [vmem:[#allocation8 + $0x1ac] sm:$0xf0] }
  0xc6   :  { %1632 = vmatpush.bf16.msra.mxu3 %v3531_v40  ;;  %v5109_v37 = vpop.f32.mrf.mxu3  ;;  %v3576_v40 = vld [vmem:[#allocation5 + $0x458] sm:$0xf0] }
  0xc7   :  { %1659 = vmatpush.bf16.msra.mxu0 %v3771_v0  ;;  %v3579_v49 = vor.u32 %v4585_v39, %v3576_v40  ;;  %v4641_v0 = vld [vmem:[#allocation5 + $0x60c] sm:$0xf]  ;;  %v4666_v39 = vld [vmem:[#allocation8 + $0xac] sm:$0xf0] }
  0xc8   :  { %1621 = vmatpush.bf16.msrb.mxu1 %v3371_v60  ;;  %v3288_v60 = vld [vmem:[#allocation5 + $0x218] sm:$0xf0]  ;;  %v3803_v17 = vor.u32 %v4641_v0, %v3800_v1  ;;  %v3970_v0 = vld [vmem:[#allocation8 + $0x140] sm:$0xf]  ;;  %v4686_v1 = vld [vmem:[#allocation8 + $0x14c] sm:$0xf0] }
  0xc9   :  { %1646 = vmatpush.bf16.msra.mxu2 %v3643_v58  ;;  %v3707_v58 = vor.u32 %v4617_v46, %v3704_v47  ;;  %v3291_v8 = vor.u32 %v4513_v59, %v3288_v60  ;;  %v3971_v10 = vor.u32 %v4686_v1, %v3970_v0  ;;  %v4722_v0 = vld [vmem:[#allocation8 + $0x26c] sm:$0xf0]  ;;  %v329_v1 = vperm.slane %v5111_v2, 1 }
  0xca   :  { %1633 = vmatpush.bf16.msra.mxu3 %v3515_v56  ;;  %v3560_v56 = vld [vmem:[#allocation5 + $0x438] sm:$0xf0]  ;;  %v1344_v62 = vpop.f32.mrf.mxu1 }
  0xcb   :  { %1660 = vmatpush.bf16.msra.mxu0 %v3755_v13  ;;  %v1357_v3 = vpop.f32.mrf.mxu2  ;;  %v3691_v13 = vor.u32 %v4613_v61, %v3688_v63  ;;  %v3842_v61 = vld [vmem:[#allocation8 + $0x40] sm:$0xf]  ;;  %v4654_v62 = vld [vmem:[#allocation8 + $0x4c] sm:$0xf0] }
  0xcc   :  { %1622 = vmatpush.bf16.msrb.mxu1 %v3355_v9  ;;  %v3416_v9 = vld [vmem:[#allocation5 + $0x318] sm:$0xf0] }
  0xcd   :  { %1647 = vmatpush.bf16.msra.mxu2 %v3627_v6  ;;  %v4545_v6 = vld [vmem:[#allocation5 + $0x30c] sm:$0xf] }
  0xce   :  { %1634 = vmatpush.bf16.msra.mxu3 %v3499_v5  ;;  %v3563_v5 = vor.u32 %v4581_v54, %v3560_v56  ;;  %v1370_v12 = vpop.f32.mrf.mxu3  ;;  %v3419_v22 = vor.u32 %v4545_v6, %v3416_v9  ;;  %v4658_v54 = vld [vmem:[#allocation8 + $0x6c] sm:$0xf0]  ;;  %v3986_v56 = vld [vmem:[#allocation8 + $0x160] sm:$0xf] }
  0xcf   :  { %1661 = vmatpush.bf16.msra.mxu0 %v3739_v7  ;;  %v4650_v9 = vld [vmem:[#allocation8 + $0x2c] sm:$0xf0] }
  0xd0   :  { %1623 = vmatpush.bf16.msrb.mxu1 %v3339_v21  ;;  %v328_v21 = vperm.slane %v5111_v2, 0  ;;  %v4682_v12 = vld [vmem:[#allocation8 + $0x12c] sm:$0xf0] }
  0xd1   :  { %1648 = vmatpush.bf16.msra.mxu2 %v3611_v19  ;;  %v4050_v19 = vld [vmem:[#allocation8 + $0x1e0] sm:$0xf] }
  0xd2   :  { %1635 = vmatpush.bf16.msra.mxu3 %v3483_v18  ;;  %v3672_v18 = vld [vmem:[#allocation5 + $0x518] sm:$0xf0]  ;;  %v4051_v28 = vor.u32 %v4706_v20, %v4050_v19  ;;  %v4738_v19 = vld [vmem:[#allocation8 + $0x2ec] sm:$0xf0] }
  0xd3   :  { %1662 = vmatpush.bf16.msra.mxu0 %v3723_v41  ;;  %v3675_v7 = vor.u32 %v4609_v55, %v3672_v18  ;;  %v5116_v34 = vpop.f32.mrf.mxu2  ;;  %v4018_v41 = vld [vmem:[#allocation8 + $0x1a0] sm:$0xf] }
  0xd4   :  { %1624 = vmatpush.bf16.msrb.mxu1 %v3323_v36  ;;  %v3907_v36 = vor.u32 %v4670_v27, %v3906_v26  ;;  %v4019_v46 = vor.u32 %v4698_v42, %v4018_v41  ;;  %v4178_v18 = vld [vmem:[#allocation8 + $0x2e0] sm:$0xf]  ;;  %v4052_v26 = vld [vmem:[#allocation8 + $0x1f0] sm:$0xf0]  ;;  %v3811_v27 = vor.u32 %v4646_v15, %v3810_v14  ;;  %v4700_v42 = vld [vmem:[#allocation8 + $0x1c4] sm:$0xf] }
  0xd5   :  { %1649 = vmatpush.bf16.msra.mxu2 %v3595_v33  ;;  %v1330_v33 = vadd.f32 %v5103_v16, %v328_v21  ;;  %v3874_v16 = vld [vmem:[#allocation8 + $0x80] sm:$0xf]  ;;  %v3924_v21 = vld [vmem:[#allocation8 + $0xf0] sm:$0xf0]  ;;  %v4652_v15 = vld [vmem:[#allocation8 + $0x44] sm:$0xf] }
  0xd6   :  { %1636 = vmatpush.bf16.msra.mxu3 %v3467_v32  ;;  %v4702_v32 = vld [vmem:[#allocation8 + $0x1cc] sm:$0xf0]  ;;  %v3875_v53 = vor.u32 %v4662_v44, %v3874_v16  ;;  %v4146_v44 = vld [vmem:[#allocation8 + $0x2a0] sm:$0xf] }
  0xd7   :  { %1663 = vmatpush.bf16.msra.mxu0 %v3707_v58  ;;  %v4035_v40 = vor.u32 %v4702_v32, %v4034_v29  ;;  %v1343_v43 = vadd.f32 %v5105_v25, %v1330_v33  ;;  %v3858_v25 = vld [vmem:[#allocation8 + $0x60] sm:$0xf] }
  0xd8   :  { %1625 = vmatpush.bf16.msrb.mxu1 %v3307_v52  ;;  %v3859_v59 = vor.u32 %v4658_v54, %v3858_v25  ;;  %v4130_v25 = vld [vmem:[#allocation8 + $0x280] sm:$0xf]  ;;  %v4726_v54 = vld [vmem:[#allocation8 + $0x28c] sm:$0xf0] }
  0xd9   :  { %1650 = vmatpush.bf16.msra.mxu2 %v3579_v49  ;;  %v4694_v49 = vld [vmem:[#allocation8 + $0x18c] sm:$0xf0]  ;;  %v1356_v50 = vadd.f32 %v5107_v31, %v1343_v43  ;;  %v4036_v43 = vld [vmem:[#allocation8 + $0x1d0] sm:$0xf0] }
  0xda   :  { %1637 = vmatpush.bf16.msra.mxu3 %v3451_v48  ;;  %v4002_v48 = vld [vmem:[#allocation8 + $0x180] sm:$0xf] }
  0xdb   :  { %1664 = vmatpush.bf16.msra.mxu0 %v3691_v13  ;;  %v1381_v47 = vpop.f32.mrf.mxu0  ;;  %v1409_v52 = vpop.f32.mrf.mxu2  ;;  %v1369_v58 = vadd.f32 %v5109_v37, %v1356_v50 }
  0xdc   :  { %1626 = vmatpush.bf16.msrb.mxu1 %v3291_v8  ;;  %v3826_v8 = vld [vmem:[#allocation8 + $0x20] sm:$0xf]  ;;  %v4020_v52 = vld [vmem:[#allocation8 + $0x1b0] sm:$0xf0] }
  0xdd   :  { %1651 = vmatpush.bf16.msra.mxu2 %v3563_v5  ;;  %v1382_v60 = vadd.f32 %v1381_v47, %v1369_v58  ;;  %v3843_v5 = vor.u32 %v4654_v62, %v3842_v61  ;;  %v3827_v13 = vor.u32 %v4650_v9, %v3826_v8  ;;  %v4664_v47 = vld [vmem:[#allocation8 + $0xa4] sm:$0xf]  ;;  %v4131_v58 = vor.u32 %v4726_v54, %v4130_v25 }
  0xde   :  { %1638 = vmatpush.bf16.msra.mxu3 %v3435_v4  ;;  %v4688_v9 = vld [vmem:[#allocation8 + $0x164] sm:$0xf] }
  0xdf   :  { %1627 = vmatmul.bf16.vlgmr.msrb.gmra.mxu1 %v5063_v51  ;;  %1665 = vmatpush.bf16.msra.mxu0 %v3675_v7  ;;  %v3891_v51 = vor.u32 %v4666_v39, %v3890_v38  ;;  %v4704_v7 = vld [vmem:[#allocation8 + $0x1e4] sm:$0xf]  ;;  %v3908_v39 = vld [vmem:[#allocation8 + $0xd0] sm:$0xf0] }
  0xe0   :  { %1678 = vmatpush.bf16.msra.mxu1 %v3803_v17  ;;  %v3955_v17 = vor.u32 %v4682_v12, %v3954_v11  ;;  %v4668_v38 = vld [vmem:[#allocation8 + $0xc4] sm:$0xf]  ;;  %v4098_v12 = vld [vmem:[#allocation8 + $0x240] sm:$0xf] }
  0xe1   :  { %1652 = vmatpush.bf16.msra.mxu2 %v3547_v23  ;;  %v4678_v23 = vld [vmem:[#allocation8 + $0x10c] sm:$0xf0]  ;;  %v3911_v16 = vor.u32 %v4668_v38, %v3908_v39  ;;  %v4644_v38 = vld [vmem:[#allocation8 + $0x4] sm:$0xf] }
  0xe2   :  { %1639 = vmatpush.bf16.msra.mxu3 %v3419_v22  ;;  %1666 = vmatmul.bf16.vlgmr.msra.gmra.mxu0 %v5081_v35  ;;  %v4690_v35 = vld [vmem:[#allocation8 + $0x16c] sm:$0xf0]  ;;  %v3938_v22 = vld [vmem:[#allocation8 + $0x100] sm:$0xf] }
  0xe3   :  { %v3987_v63 = vor.u32 %v4690_v35, %v3986_v56  ;;  %v1383_v3 = vpop.f32.mrf.mxu0  ;;  %v3939_v33 = vor.u32 %v4678_v23, %v3938_v22  ;;  %v3876_v56 = vld [vmem:[#allocation8 + $0x90] sm:$0xf0] }
  0xe4   :  { %2483 = vmatpush.bf16.msrb.mxu1 %v4051_v28  ;;  %1653 = vmatmul.bf16.vlgmr.msra.gmra.mxu2 %v5079_v30  ;;  %v4003_v30 = vor.u32 %v4694_v49, %v4002_v48  ;;  %v5124_v31 = vpop.f32.mrf.mxu3  ;;  %v3892_v48 = vld [vmem:[#allocation8 + $0xb0] sm:$0xf0]  ;;  %v4039_v49 = vor.u32 %v4700_v42, %v4036_v43  ;;  %v4710_v42 = vld [vmem:[#allocation8 + $0x20c] sm:$0xf0]  ;;  %v3930_v43 = vld [vmem:[#allocation8 + $0xe8] sm:$0xf] }
  0xe5   :  { %1640 = vmatmul.bf16.vlgmr.msra.gmra.mxu3 %v5067_v57  ;;  %v1394_v57 = vpop.f32.mrf.mxu1  ;;  %v1421_v14 = vadd.f32 %v5124_v31, %v329_v1 }
  0xe6   :  { %2470 = vmatpush.bf16.msrb.mxu3 %v3923_v24  ;;  %v1395_v37 = vadd.f32 %v1394_v57, %v1382_v60  ;;  %v4179_v24 = vor.u32 %v4738_v19, %v4178_v18  ;;  %v4696_v57 = vld [vmem:[#allocation8 + $0x1a4] sm:$0xf]  ;;  %v4004_v60 = vld [vmem:[#allocation8 + $0x190] sm:$0xf0] }
  0xe7   :  { %v5128_v6 = vpop.f32.mrf.mxu2  ;;  %v4023_v35 = vor.u32 %v4696_v57, %v4020_v52  ;;  %v4684_v19 = vld [vmem:[#allocation8 + $0x144] sm:$0xf] }
  0xe8   :  { %2484 = vmatpush.bf16.msrb.mxu1 %v4035_v40  ;;  %v1408_v55 = vadd.f32 %v5116_v34, %v1395_v37  ;;  %2496 = vmatpush.bf16.msrb.mxu2 %v4179_v24  ;;  %v4162_v34 = vld [vmem:[#allocation8 + $0x2c0] sm:$0xf]  ;;  %v4055_v40 = vor.u32 %v4704_v7, %v4052_v26  ;;  %v4714_v7 = vld [vmem:[#allocation8 + $0x22c] sm:$0xf0]  ;;  %v1434_v26 = vadd.f32 %v5128_v6, %v1421_v14  ;;  %v4058_v14 = vld [vmem:[#allocation8 + $0x1e8] sm:$0xf] }
  0xe9   :  { %v4082_v24 = vld [vmem:[#allocation8 + $0x220] sm:$0xf] }
  0xea   :  { %2471 = vmatpush.bf16.msrb.mxu3 %v3907_v36  ;;  %v1684_v29 = vmax.f32 %v1408_v55, 0.0  ;;  %v4734_v36 = vld [vmem:[#allocation8 + $0x2cc] sm:$0xf0]  ;;  %v3844_v55 = vld [vmem:[#allocation8 + $0x50] sm:$0xf0] }
  0xeb   :  { %v4163_v41 = vor.u32 %v4734_v36, %v4162_v34  ;;  %v3847_v23 = vor.u32 %v4652_v15, %v3844_v55  ;;  %v3956_v34 = vld [vmem:[#allocation8 + $0x130] sm:$0xf0]  ;;  %v4707_v15 = vld [vmem:[#allocation8 + $0x1f4] sm:$0xf0] }
  0xec   :  { %2485 = vmatpush.bf16.msrb.mxu1 %v4019_v46  ;;  %v1422_v20 = vpop.f32.mrf.mxu3  ;;  %v4730_v46 = vld [vmem:[#allocation8 + $0x2ac] sm:$0xf0] }
  0xed   :  { %v1396_v4 = vpop.f32.mrf.mxu1  ;;  %2497 = vmatpush.bf16.msrb.mxu2 %v4163_v41  ;;  %v4147_v50 = vor.u32 %v4730_v46, %v4146_v44  ;;  %v3972_v20 = vld [vmem:[#allocation8 + $0x150] sm:$0xf0]  ;;  %v4066_v41 = vld [vmem:[#allocation8 + $0x200] sm:$0xf]  ;;  %v4736_v44 = vld [vmem:[#allocation8 + $0x2e4] sm:$0xf] }
  0xee   :  { %2472 = vmatpush.bf16.msrb.mxu3 %v3891_v51  ;;  %v5131_v51 = vpack.c.bf16 %v1684_v29, %v1684_v29  ;;  %v4656_v4 = vld [vmem:[#allocation8 + $0x64] sm:$0xf]  ;;  %v3975_v31 = vor.u32 %v4684_v19, %v3972_v20  ;;  %v4067_v6 = vor.u32 %v4710_v42, %v4066_v41  ;;  %v4180_v46 = vld [vmem:[#allocation8 + $0x2f0] sm:$0xf0]  ;;  %v4663_v19 = vld [vmem:[#allocation8 + $0x94] sm:$0xf0] }
  0xef   :  { %3807 = vmatmul.msk.bf16.vlgmr.msra.gmra.mxu1 %vm1316_vm0, %v5075_v45  ;;  %v4672_v45 = vld [vmem:[#allocation8 + $0xe4] sm:$0xf]  ;;  %v1435_v28 = vpop.f32.mrf.mxu2  ;;  %v4183_v57 = vor.u32 %v4736_v44, %v4180_v46  ;;  %v4258_v42 = vld [vmem:[#allocation8 + $0x380] sm:$0xf] }
  0xf0   :  { %2486 = vmatpush.bf16.msrb.mxu1 %v4003_v30  ;;  %v3927_v32 = vor.u32 %v4672_v45, %v3924_v21  ;;  %v4660_v30 = vld [vmem:[#allocation8 + $0x84] sm:$0xf]  ;;  %v3828_v28 = vld [vmem:[#allocation8 + $0x30] sm:$0xf0] }
  0xf1   :  { %2498 = vmatpush.bf16.msrb.mxu2 %v4147_v50  ;;  %v3879_v62 = vor.u32 %v4660_v30, %v3876_v56  ;;  %v3940_v50 = vld [vmem:[#allocation8 + $0x110] sm:$0xf0]  ;;  %v3914_v56 = vld [vmem:[#allocation8 + $0xc8] sm:$0xf]  ;;  %v4724_v20 = vld [vmem:[#allocation8 + $0x284] sm:$0xf] }
  0xf2   :  { %2473 = vmatpush.bf16.msrb.mxu3 %v3875_v53  ;;  %v3895_v53 = vor.u32 %v4664_v47, %v3892_v48  ;;  %v4675_v48 = vld [vmem:[#allocation8 + $0xf4] sm:$0xf0] }
  0xf3   :  { %v3931_v30 = vor.u32 %v4675_v48, %v3930_v43  ;;  %v4758_v43 = vld [vmem:[#allocation8 + $0x38c] sm:$0xf0]  ;;  %v3850_v48 = vld [vmem:[#allocation8 + $0x48] sm:$0xf] }
  0xf4   :  { %2487 = vmatpush.bf16.msrb.mxu1 %v3987_v63  ;;  %v4114_v63 = vld [vmem:[#allocation8 + $0x260] sm:$0xf]  ;;  %v4259_v44 = vor.u32 %v4758_v43, %v4258_v42  ;;  %v4768_v42 = vld [vmem:[#allocation8 + $0x3e4] sm:$0xf]  ;;  %v4308_v43 = vld [vmem:[#allocation8 + $0x3f0] sm:$0xf0] }
  0xf5   :  { %2499 = vmatpush.bf16.msrb.mxu2 %v4131_v58  ;;  %v4115_v8 = vor.u32 %v4722_v0, %v4114_v63  ;;  %v4732_v58 = vld [vmem:[#allocation8 + $0x2c4] sm:$0xf]  ;;  %v4770_v63 = vld [vmem:[#allocation8 + $0x3ec] sm:$0xf0] }
  0xf6   :  { %2474 = vmatpush.bf16.msrb.mxu3 %v3859_v59  ;;  %v4692_v59 = vld [vmem:[#allocation8 + $0x184] sm:$0xf] }
  0xf7   :  { %v4007_v37 = vor.u32 %v4692_v59, %v4004_v60  ;;  %v4164_v59 = vld [vmem:[#allocation8 + $0x2d0] sm:$0xf0]  ;;  %v4671_v60 = vld [vmem:[#allocation8 + $0xd4] sm:$0xf0] }
  0xf8   :  { %2488 = vmatpush.bf16.msrb.mxu1 %v3971_v10  ;;  %v3988_v10 = vld [vmem:[#allocation8 + $0x170] sm:$0xf0] }
  0xf9   :  { %2500 = vmatpush.bf16.msrb.mxu2 %v4115_v8  ;;  %v3991_v45 = vor.u32 %v4688_v9, %v3988_v10  ;;  %v4667_v9 = vld [vmem:[#allocation8 + $0xb4] sm:$0xf0] }
  0xfa   :  { %2475 = vmatpush.bf16.msrb.mxu3 %v3843_v5  ;;  %v3860_v5 = vld [vmem:[#allocation8 + $0x70] sm:$0xf0] }
  0xfb   :  { %v1446_v61 = vpop.f32.mrf.mxu0  ;;  %v3863_v11 = vor.u32 %v4656_v4, %v3860_v5  ;;  %v3898_v4 = vld [vmem:[#allocation8 + $0xa8] sm:$0xf]  ;;  %v4728_v5 = vld [vmem:[#allocation8 + $0x2a4] sm:$0xf] }
  0xfc   :  { %2489 = vmatpush.bf16.msrb.mxu1 %v3955_v17  ;;  %v1459_v3 = vpop.f32.mrf.mxu1  ;;  %v1447_v36 = vadd.f32 %v1446_v61, %v1434_v26  ;;  %v4167_v61 = vor.u32 %v4732_v58, %v4164_v59  ;;  %v4042_v26 = vld [vmem:[#allocation8 + $0x1c8] sm:$0xf] }
  0xfd   :  { %v3834_v59 = vld [vmem:[#allocation8 + $0x28] sm:$0xf] }
  0xfe   :  { %2476 = vmatpush.bf16.msrb.mxu3 %v3827_v13  ;;  %v4718_v13 = vld [vmem:[#allocation8 + $0x24c] sm:$0xf0]  ;;  %v1460_v52 = vadd.f32 %v1459_v3, %v1447_v36  ;;  %v3915_v3 = vor.u32 %v4671_v60, %v3914_v56  ;;  %v4695_v56 = vld [vmem:[#allocation8 + $0x194] sm:$0xf0]  ;;  %v4712_v60 = vld [vmem:[#allocation8 + $0x224] sm:$0xf] }
  0xff   :  { %v4099_v17 = vor.u32 %v4718_v13, %v4098_v12  ;;  %v4766_v12 = vld [vmem:[#allocation8 + $0x3cc] sm:$0xf0] }
 0x100   :  { %2490 = vmatpush.bf16.msrb.mxu1 %v3939_v33  ;;  %v4680_v33 = vld [vmem:[#allocation8 + $0x124] sm:$0xf] }
 0x101   :  { %2501 = vmatpush.bf16.msrb.mxu2 %v4099_v17 }
 0x102   :  { %2477 = vmatpush.bf16.msrb.mxu3 %v3811_v27  ;;  %v4648_v27 = vld [vmem:[#allocation8 + $0x24] sm:$0xf] }
 0x103   :  { %v1448_v21 = vpop.f32.mrf.mxu0  ;;  %v3831_v39 = vor.u32 %v4648_v27, %v3828_v28  ;;  %v4703_v27 = vld [vmem:[#allocation8 + $0x1d4] sm:$0xf0] }
 0x104   :  { %2535 = vmatpush.bf16.msra.mxu1 %v4055_v40  ;;  %v1472_v18 = vpop.f32.mrf.mxu3  ;;  %v1461_v29 = vpop.f32.mrf.mxu1  ;;  %v3812_v40 = vld [vmem:[#allocation8 + $0x10] sm:$0xf0]  ;;  %v4059_v21 = vor.u32 %v4707_v15, %v4058_v14  ;;  %v4647_v14 = vld [vmem:[#allocation8 + $0x14] sm:$0xf0]  ;;  %v4708_v15 = vld [vmem:[#allocation8 + $0x204] sm:$0xf] }
 0x105   :  { %2478 = vmatmul.bf16.vlgmr.msrb.gmra.mxu3 %v5131_v51  ;;  %v1473_v54 = vadd.f32 %v1472_v18, %v1460_v52  ;;  %v3899_v18 = vor.u32 %v4667_v9, %v3898_v4  ;;  %v4655_v52 = vld [vmem:[#allocation8 + $0x54] sm:$0xf0]  ;;  %v4226_v4 = vld [vmem:[#allocation8 + $0x340] sm:$0xf] }
 0x106   :  { %2522 = vmatpush.bf16.msra.mxu3 %v3927_v32  ;;  %v4083_v32 = vor.u32 %v4714_v7, %v4082_v24  ;;  %v4762_v24 = vld [vmem:[#allocation8 + $0x3ac] sm:$0xf0]  ;;  %v3851_v58 = vor.u32 %v4655_v52, %v3850_v48  ;;  %v3900_v52 = vld [vmem:[#allocation8 + $0xb8] sm:$0xf0] }
 0x107   :  { %v1485_v22 = vpop.f32.mrf.mxu2 }
 0x108   :  { %2536 = vmatpush.bf16.msra.mxu1 %v4039_v49  ;;  %2502 = vmatpush.bf16.msrb.mxu2 %v4083_v32  ;;  %v4676_v49 = vld [vmem:[#allocation8 + $0x104] sm:$0xf]  ;;  %v1486_v1 = vadd.f32 %v1485_v22, %v1473_v54  ;;  %v4132_v22 = vld [vmem:[#allocation8 + $0x290] sm:$0xf0]  ;;  %v3866_v32 = vld [vmem:[#allocation8 + $0x68] sm:$0xf] }
 0x109   :  { %v4135_v28 = vor.u32 %v4724_v20, %v4132_v22  ;;  %v4754_v54 = vld [vmem:[#allocation8 + $0x36c] sm:$0xf0]  ;;  %v4673_v22 = vld [vmem:[#allocation8 + $0xec] sm:$0xf] }
 0x10a   :  { %2523 = vmatpush.bf16.msra.mxu3 %v3911_v16  ;;  %v3959_v16 = vor.u32 %v4680_v33, %v3956_v34  ;;  %v4720_v33 = vld [vmem:[#allocation8 + $0x264] sm:$0xf]  ;;  %v4116_v34 = vld [vmem:[#allocation8 + $0x270] sm:$0xf0]  ;;  %v4746_v20 = vld [vmem:[#allocation8 + $0x32c] sm:$0xf0] }
 0x10b   :  { %v4119_v41 = vor.u32 %v4720_v33, %v4116_v34 }
 0x10c   :  { %2537 = vmatpush.bf16.msra.mxu1 %v4023_v35  ;;  %v1474_v47 = vpop.f32.mrf.mxu3  ;;  %2503 = vmatpush.bf16.msrb.mxu2 %v4067_v6  ;;  %v3943_v35 = vor.u32 %v4676_v49, %v3940_v50  ;;  %v4699_v6 = vld [vmem:[#allocation8 + $0x1b4] sm:$0xf0]  ;;  %v4716_v49 = vld [vmem:[#allocation8 + $0x244] sm:$0xf]  ;;  %v4100_v50 = vld [vmem:[#allocation8 + $0x250] sm:$0xf0] }
 0x10e   :  { %2524 = vmatpush.bf16.msra.mxu3 %v3895_v53  ;;  %v3815_v53 = vor.u32 %v4644_v38, %v3812_v40  ;;  %v4659_v40 = vld [vmem:[#allocation8 + $0x74] sm:$0xf0] }
 0x10f   :  { %v1487_v25 = vpop.f32.mrf.mxu2  ;;  %v3867_v47 = vor.u32 %v4659_v40, %v3866_v32  ;;  %v4669_v32 = vld [vmem:[#allocation8 + $0xcc] sm:$0xf]  ;;  %v3916_v40 = vld [vmem:[#allocation8 + $0xd8] sm:$0xf0] }
 0x110   :  { %2538 = vmatpush.bf16.msra.mxu1 %v4007_v37  ;;  %2548 = vmatpush.bf16.msra.mxu2 %v4183_v57  ;;  %v4148_v37 = vld [vmem:[#allocation8 + $0x2b0] sm:$0xf0]  ;;  %v4242_v25 = vld [vmem:[#allocation8 + $0x360] sm:$0xf]  ;;  %v3919_v48 = vor.u32 %v4669_v32, %v3916_v40  ;;  %v3836_v40 = vld [vmem:[#allocation8 + $0x38] sm:$0xf0] }
 0x111   :  { %v4151_v10 = vor.u32 %v4728_v5, %v4148_v37  ;;  %v4750_v5 = vld [vmem:[#allocation8 + $0x34c] sm:$0xf0]  ;;  %v3994_v37 = vld [vmem:[#allocation8 + $0x168] sm:$0xf] }
 0x112   :  { %2525 = vmatpush.bf16.msra.mxu3 %v3879_v62  ;;  %v4306_v62 = vld [vmem:[#allocation8 + $0x3e0] sm:$0xf]  ;;  %v4227_v9 = vor.u32 %v4750_v5, %v4226_v4  ;;  %v4701_v5 = vld [vmem:[#allocation8 + $0x1cc] sm:$0xf] }
 0x113   :  { %v4307_v0 = vor.u32 %v4770_v63, %v4306_v62 }
 0x114   :  { %2539 = vmatpush.bf16.msra.mxu1 %v3991_v45  ;;  %2549 = vmatpush.bf16.msra.mxu2 %v4167_v61  ;;  %v1498_v8 = vpop.f32.mrf.mxu3  ;;  %v3882_v45 = vld [vmem:[#allocation8 + $0x88] sm:$0xf]  ;;  %v4084_v61 = vld [vmem:[#allocation8 + $0x230] sm:$0xf0] }
 0x115   :  { %2509 = vmatpush.bf16.msrb.mxu0 %v4307_v0  ;;  %v1499_v13 = vadd.f32 %v1498_v8, %v1486_v1  ;;  %v3883_v29 = vor.u32 %v4663_v19, %v3882_v45  ;;  %v4651_v1 = vld [vmem:[#allocation8 + $0x34] sm:$0xf0]  ;;  %v4210_v19 = vld [vmem:[#allocation8 + $0x320] sm:$0xf] }
 0x116   :  { %2526 = vmatpush.bf16.msra.mxu3 %v3863_v11  ;;  %v4290_v11 = vld [vmem:[#allocation8 + $0x3c0] sm:$0xf]  ;;  %v4691_v8 = vld [vmem:[#allocation8 + $0x174] sm:$0xf0] }
 0x117   :  { %v4291_v55 = vor.u32 %v4766_v12, %v4290_v11  ;;  %v1685_v17 = vmax.f32 %v1499_v13, 0.0  ;;  %v3818_v11 = vld [vmem:[#allocation8 + $0x8] sm:$0xf]  ;;  %v3835_v13 = vor.u32 %v4651_v1, %v3834_v59  ;;  %v3995_v45 = vor.u32 %v4691_v8, %v3994_v37  ;;  %v4760_v1 = vld [vmem:[#allocation8 + $0x3a4] sm:$0xf] }
 0x118   :  { %2540 = vmatpush.bf16.msra.mxu1 %v3975_v31  ;;  %2550 = vmatpush.bf16.msra.mxu2 %v4151_v10 }
 0x119   :  { %2510 = vmatpush.bf16.msrb.mxu0 %v4291_v55  ;;  %v5138_v7 = vpack.c.bf16 %v1685_v17, %v1685_v17  ;;  %v4068_v55 = vld [vmem:[#allocation8 + $0x210] sm:$0xf0]  ;;  %v3978_v17 = vld [vmem:[#allocation8 + $0x148] sm:$0xf] }
 0x11a   :  { %2527 = vmatpush.bf16.msra.mxu3 %v3847_v23  ;;  %v4274_v23 = vld [vmem:[#allocation8 + $0x3a0] sm:$0xf] }
 0x11b   :  { %v4275_v31 = vor.u32 %v4762_v24, %v4274_v23  ;;  %2491 = vmatmul.bf16.vlgmr.msrb.gmra.mxu1 %v5138_v7  ;;  %v5141_v38 = vpop.f32.mrf.mxu0  ;;  %v3932_v23 = vld [vmem:[#allocation8 + $0xf8] sm:$0xf0]  ;;  %v4211_v24 = vor.u32 %v4746_v20, %v4210_v19  ;;  %v4653_v19 = vld [vmem:[#allocation8 + $0x4c] sm:$0xf] }
 0x11c   :  { %2541 = vmatpush.bf16.msra.mxu1 %v3959_v16  ;;  %v1500_v36 = vpop.f32.mrf.mxu3  ;;  %2551 = vmatpush.bf16.msra.mxu2 %v4135_v28  ;;  %v4026_v16 = vld [vmem:[#allocation8 + $0x1a8] sm:$0xf]  ;;  %v5143_v46 = vpop.f32.mrf.mxu1  ;;  %v4683_v28 = vld [vmem:[#allocation8 + $0x134] sm:$0xf0] }
 0x11d   :  { %2511 = vmatpush.bf16.msrb.mxu0 %v4275_v31  ;;  %v4027_v57 = vor.u32 %v4699_v6, %v4026_v16  ;;  %v4194_v36 = vld [vmem:[#allocation8 + $0x300] sm:$0xf]  ;;  %v330_v16 = vperm.slane %v5111_v2, 2 }
 0x11e   :  { %2528 = vmatpush.bf16.msra.mxu3 %v3831_v39  ;;  %v4043_v39 = vor.u32 %v4703_v27, %v4042_v26  ;;  %v3819_v26 = vor.u32 %v4647_v14, %v3818_v11  ;;  %v3962_v27 = vld [vmem:[#allocation8 + $0x128] sm:$0xf]  ;;  %v4657_v11 = vld [vmem:[#allocation8 + $0x6c] sm:$0xf]  ;;  %v4756_v14 = vld [vmem:[#allocation8 + $0x384] sm:$0xf] }
 0x120   :  { %2542 = vmatpush.bf16.msra.mxu1 %v3943_v35  ;;  %2552 = vmatpush.bf16.msra.mxu2 %v4119_v41  ;;  %v4243_v35 = vor.u32 %v4754_v54, %v4242_v25  ;;  %v4292_v25 = vld [vmem:[#allocation8 + $0x3d0] sm:$0xf0]  ;;  %v1512_v54 = vadd.f32 %v5143_v46, %v330_v16  ;;  %v4044_v46 = vld [vmem:[#allocation8 + $0x1d8] sm:$0xf0]  ;;  %v4689_v16 = vld [vmem:[#allocation8 + $0x16c] sm:$0xf] }
 0x121   :  { %2512 = vmatpush.bf16.msrb.mxu0 %v4259_v44  ;;  %v4311_v44 = vor.u32 %v4768_v42, %v4308_v43  ;;  %v4228_v42 = vld [vmem:[#allocation8 + $0x350] sm:$0xf0] }
 0x122   :  { %2529 = vmatpush.bf16.msra.mxu3 %v3815_v53  ;;  %v4103_v53 = vor.u32 %v4716_v49, %v4100_v50  ;;  %v3946_v49 = vld [vmem:[#allocation8 + $0x108] sm:$0xf]  ;;  %v4679_v50 = vld [vmem:[#allocation8 + $0x114] sm:$0xf0] }
 0x123   :  { %v1539_v63 = vpop.f32.mrf.mxu0 }
 0x124   :  { %2587 = vmatpush.bf16.msrb.mxu1 %v4059_v21  ;;  %2553 = vmatpush.bf16.msra.mxu2 %v4103_v53  ;;  %v1513_v12 = vpop.f32.mrf.mxu1  ;;  %v4687_v21 = vld [vmem:[#allocation8 + $0x154] sm:$0xf0]  ;;  %v4764_v53 = vld [vmem:[#allocation8 + $0x3c4] sm:$0xf] }
 0x125   :  { %2530 = vmatmul.bf16.vlgmr.msra.gmra.mxu3 %v5131_v51  ;;  %2513 = vmatpush.bf16.msrb.mxu0 %v4243_v35  ;;  %v3979_v31 = vor.u32 %v4687_v21, %v3978_v17  ;;  %v4295_v35 = vor.u32 %v4764_v53, %v4292_v25  ;;  %v4047_v12 = vor.u32 %v4701_v5, %v4044_v46  ;;  %v4028_v17 = vld [vmem:[#allocation8 + $0x1b8] sm:$0xf0]  ;;  %v4744_v25 = vld [vmem:[#allocation8 + $0x324] sm:$0xf]  ;;  %v4196_v5 = vld [vmem:[#allocation8 + $0x310] sm:$0xf0] }
 0x126   :  { %2574 = vmatpush.bf16.msrb.mxu3 %v3931_v30  ;;  %v4010_v30 = vld [vmem:[#allocation8 + $0x188] sm:$0xf]  ;;  %v3852_v21 = vld [vmem:[#allocation8 + $0x58] sm:$0xf0]  ;;  %v4681_v46 = vld [vmem:[#allocation8 + $0x12c] sm:$0xf] }
 0x127   :  { %v4011_v0 = vor.u32 %v4695_v56, %v4010_v30  ;;  %v5147_v10 = vpop.f32.mrf.mxu2  ;;  %v4705_v30 = vld [vmem:[#allocation8 + $0x1ec] sm:$0xf]  ;;  %v4060_v56 = vld [vmem:[#allocation8 + $0x1f8] sm:$0xf0] }
 0x128   :  { %2588 = vmatpush.bf16.msrb.mxu1 %v4043_v39  ;;  %v5145_v62 = vpop.f32.mrf.mxu3  ;;  %v4742_v39 = vld [vmem:[#allocation8 + $0x30c] sm:$0xf0]  ;;  %v4063_v63 = vor.u32 %v4705_v30, %v4060_v56  ;;  %v3820_v53 = vld [vmem:[#allocation8 + $0x18] sm:$0xf0]  ;;  %v4685_v56 = vld [vmem:[#allocation8 + $0x14c] sm:$0xf] }
 0x129   :  { %2514 = vmatpush.bf16.msrb.mxu0 %v4227_v9  ;;  %v4195_v41 = vor.u32 %v4742_v39, %v4194_v36  ;;  %v1525_v4 = vadd.f32 %v5145_v62, %v1512_v54  ;;  %v4212_v54 = vld [vmem:[#allocation8 + $0x330] sm:$0xf0] }
 0x12a   :  { %2575 = vmatpush.bf16.msrb.mxu3 %v3915_v3  ;;  %v4087_v3 = vor.u32 %v4712_v60, %v4084_v61  ;;  %v4661_v60 = vld [vmem:[#allocation8 + $0x8c] sm:$0xf] }
 0x12b   :  { %2543 = vmatmul.bf16.vlgmr.msra.gmra.mxu1 %v5138_v7  ;;  %v5150_v34 = vpop.f32.mrf.mxu0 }
 0x12c   :  { %2589 = vmatpush.bf16.msrb.mxu1 %v4027_v57  ;;  %2554 = vmatpush.bf16.msra.mxu2 %v4087_v3  ;;  %v4665_v57 = vld [vmem:[#allocation8 + $0xac] sm:$0xf]  ;;  %v4276_v3 = vld [vmem:[#allocation8 + $0x3b0] sm:$0xf0] }
 0x12d   :  { %2515 = vmatpush.bf16.msrb.mxu0 %v4211_v24  ;;  %v3903_v59 = vor.u32 %v4665_v57, %v3900_v52  ;;  %v4279_v37 = vor.u32 %v4760_v1, %v4276_v3  ;;  %v4645_v57 = vld [vmem:[#allocation8 + $0xc] sm:$0xf] }
 0x12e   :  { %2576 = vmatpush.bf16.msrb.mxu3 %v3899_v18  ;;  %v4071_v18 = vor.u32 %v4708_v15, %v4068_v55  ;;  %v4260_v15 = vld [vmem:[#allocation8 + $0x390] sm:$0xf0]  ;;  %v1538_v55 = vadd.f32 %v5141_v38, %v1525_v4  ;;  %v4740_v4 = vld [vmem:[#allocation8 + $0x304] sm:$0xf] }
 0x12f   :  { %v1552_v6 = vpop.f32.mrf.mxu2  ;;  %v4263_v62 = vor.u32 %v4756_v14, %v4260_v15  ;;  %v4677_v15 = vld [vmem:[#allocation8 + $0x10c] sm:$0xf] }
 0x130   :  { %2590 = vmatpush.bf16.msrb.mxu1 %v4011_v0  ;;  %v1526_v33 = vpop.f32.mrf.mxu3  ;;  %2555 = vmatpush.bf16.msra.mxu2 %v4071_v18  ;;  %v3884_v0 = vld [vmem:[#allocation8 + $0x98] sm:$0xf0]  ;;  %v1551_v24 = vadd.f32 %v5147_v10, %v1538_v55 }
 0x131   :  { %2516 = vmatpush.bf16.msrb.mxu0 %v4195_v41  ;;  %v3887_v9 = vor.u32 %v4661_v60, %v3884_v0  ;;  %v4649_v33 = vld [vmem:[#allocation8 + $0x2c] sm:$0xf]  ;;  %v4748_v41 = vld [vmem:[#allocation8 + $0x344] sm:$0xf]  ;;  %v3996_v10 = vld [vmem:[#allocation8 + $0x178] sm:$0xf0] }
 0x132   :  { %2577 = vmatpush.bf16.msrb.mxu3 %v3883_v29  ;;  %v3935_v29 = vor.u32 %v4673_v22, %v3932_v23  ;;  %v4752_v22 = vld [vmem:[#allocation8 + $0x364] sm:$0xf]  ;;  %v4244_v23 = vld [vmem:[#allocation8 + $0x370] sm:$0xf0]  ;;  %v3999_v52 = vor.u32 %v4689_v16, %v3996_v10  ;;  %v4735_v0 = vld [vmem:[#allocation8 + $0x2d4] sm:$0xf0] }
 0x133   :  { %v1591_v61 = vpop.f32.mrf.mxu0  ;;  %v4247_v38 = vor.u32 %v4752_v22, %v4244_v23  ;;  %v3948_v55 = vld [vmem:[#allocation8 + $0x118] sm:$0xf0]  ;;  %v4723_v22 = vld [vmem:[#allocation8 + $0x274] sm:$0xf0]  ;;  %v4737_v10 = vld [vmem:[#allocation8 + $0x2ec] sm:$0xf] }
 0x134   :  { %2591 = vmatpush.bf16.msrb.mxu1 %v3995_v45  ;;  %v4697_v45 = vld [vmem:[#allocation8 + $0x1ac] sm:$0xf] }
 0x135   :  { %2561 = vmatpush.bf16.msra.mxu0 %v4311_v44  ;;  %v4031_v20 = vor.u32 %v4697_v45, %v4028_v17  ;;  %v4231_v44 = vor.u32 %v4748_v41, %v4228_v42  ;;  %v4138_v17 = vld [vmem:[#allocation8 + $0x288] sm:$0xf] }
 0x136   :  { %2578 = vmatpush.bf16.msrb.mxu3 %v3867_v47  ;;  %v3963_v47 = vor.u32 %v4683_v28, %v3962_v27  ;;  %v4012_v27 = vld [vmem:[#allocation8 + $0x198] sm:$0xf0] }
 0x138   :  { %2592 = vmatpush.bf16.msrb.mxu1 %v3979_v31 }
 0x139   :  { %2562 = vmatpush.bf16.msra.mxu0 %v4295_v35  ;;  %v3980_v35 = vld [vmem:[#allocation8 + $0x158] sm:$0xf0] }
 0x13a   :  { %2579 = vmatpush.bf16.msrb.mxu3 %v3851_v58  ;;  %v3947_v58 = vor.u32 %v4679_v50, %v3946_v49  ;;  %v4186_v49 = vld [vmem:[#allocation8 + $0x2e8] sm:$0xf]  ;;  %v4739_v50 = vld [vmem:[#allocation8 + $0x2f4] sm:$0xf0]  ;;  %v3983_v1 = vor.u32 %v4685_v56, %v3980_v35 }
 0x13b   :  { %v4187_v60 = vor.u32 %v4739_v50, %v4186_v49  ;;  %v4733_v50 = vld [vmem:[#allocation8 + $0x2cc] sm:$0xf] }
 0x13c   :  { %2593 = vmatpush.bf16.msrb.mxu1 %v3963_v47  ;;  %v1563_v8 = vpop.f32.mrf.mxu1 }
 0x13d   :  { %2563 = vmatpush.bf16.msra.mxu0 %v4279_v37  ;;  %v1564_v31 = vadd.f32 %v1563_v8, %v1551_v24  ;;  %v3964_v37 = vld [vmem:[#allocation8 + $0x138] sm:$0xf0] }
 0x13e   :  { %2580 = vmatpush.bf16.msrb.mxu3 %v3835_v13  ;;  %v3868_v13 = vld [vmem:[#allocation8 + $0x78] sm:$0xf0]  ;;  %v3967_v14 = vor.u32 %v4681_v46, %v3964_v37  ;;  %v4282_v37 = vld [vmem:[#allocation8 + $0x3a8] sm:$0xf] }
 0x13f   :  { %v3871_v18 = vor.u32 %v4657_v11, %v3868_v13  ;;  %v5159_v28 = vpop.f32.mrf.mxu0  ;;  %v4731_v13 = vld [vmem:[#allocation8 + $0x2b4] sm:$0xf0]  ;;  %v4140_v46 = vld [vmem:[#allocation8 + $0x298] sm:$0xf0] }
 0x140   :  { %2594 = vmatpush.bf16.msrb.mxu1 %v3947_v58 }
 0x141   :  { %2564 = vmatpush.bf16.msra.mxu0 %v4263_v62  ;;  %v4727_v62 = vld [vmem:[#allocation8 + $0x294] sm:$0xf0] }
 0x142   :  { %2581 = vmatpush.bf16.msrb.mxu3 %v3819_v26  ;;  %v4693_v26 = vld [vmem:[#allocation8 + $0x18c] sm:$0xf] }
 0x143   :  { %2595 = vmatmul.bf16.vlgmr.msrb.gmra.mxu1 %v5138_v7  ;;  %v4015_v39 = vor.u32 %v4693_v26, %v4012_v27  ;;  %v4106_v27 = vld [vmem:[#allocation8 + $0x248] sm:$0xf] }
 0x144   :  { %2639 = vmatpush.bf16.msra.mxu1 %v4063_v63  ;;  %v1565_v32 = vpop.f32.mrf.mxu1  ;;  %v4170_v63 = vld [vmem:[#allocation8 + $0x2c8] sm:$0xf] }
 0x145   :  { %2582 = vmatmul.bf16.vlgmr.msrb.gmra.mxu3 %v5131_v51  ;;  %2565 = vmatpush.bf16.msra.mxu0 %v4247_v38  ;;  %v4171_v11 = vor.u32 %v4735_v0, %v4170_v63  ;;  %v4715_v32 = vld [vmem:[#allocation8 + $0x234] sm:$0xf0]  ;;  %v4298_v63 = vld [vmem:[#allocation8 + $0x3c8] sm:$0xf] }
 0x146   :  { %2626 = vmatpush.bf16.msra.mxu3 %v3935_v29  ;;  %v3855_v29 = vor.u32 %v4653_v19, %v3852_v21  ;;  %v3951_v19 = vor.u32 %v4677_v15, %v3948_v55  ;;  %v4122_v21 = vld [vmem:[#allocation8 + $0x268] sm:$0xf]  ;;  %v4767_v0 = vld [vmem:[#allocation8 + $0x3d4] sm:$0xf0] }
 0x147   :  { %v1602_v6 = vpop.f32.mrf.mxu2  ;;  %v1617_v58 = vpop.f32.mrf.mxu0  ;;  %v4123_v26 = vor.u32 %v4723_v22, %v4122_v21  ;;  %v4759_v15 = vld [vmem:[#allocation8 + $0x394] sm:$0xf0]  ;;  %v4713_v22 = vld [vmem:[#allocation8 + $0x22c] sm:$0xf] }
 0x148   :  { %2640 = vmatpush.bf16.msra.mxu1 %v4047_v12  ;;  %v1576_v36 = vpop.f32.mrf.mxu3  ;;  %v4154_v12 = vld [vmem:[#allocation8 + $0x2a8] sm:$0xf] }
 0x149   :  { %v1577_v43 = vadd.f32 %v1576_v36, %v1564_v31  ;;  %2566 = vmatpush.bf16.msra.mxu0 %v4231_v44  ;;  %v4155_v45 = vor.u32 %v4731_v13, %v4154_v12  ;;  %v4721_v12 = vld [vmem:[#allocation8 + $0x26c] sm:$0xf]  ;;  %v4124_v13 = vld [vmem:[#allocation8 + $0x278] sm:$0xf0] }
 0x14a   :  { %2627 = vmatpush.bf16.msra.mxu3 %v3919_v48  ;;  %v3839_v48 = vor.u32 %v4649_v33, %v3836_v40  ;;  %v4127_v55 = vor.u32 %v4721_v12, %v4124_v13 }
 0x14b   :  { %v1590_v47 = vadd.f32 %v5150_v34, %v1577_v43  ;;  %v3823_v34 = vor.u32 %v4645_v57, %v3820_v53  ;;  %v4074_v43 = vld [vmem:[#allocation8 + $0x208] sm:$0xf]  ;;  %v4172_v57 = vld [vmem:[#allocation8 + $0x2d8] sm:$0xf0] }
 0x14c   :  { %2641 = vmatpush.bf16.msra.mxu1 %v4031_v20  ;;  %v4139_v20 = vor.u32 %v4727_v62, %v4138_v17  ;;  %v4175_v35 = vor.u32 %v4733_v50, %v4172_v57  ;;  %v4717_v17 = vld [vmem:[#allocation8 + $0x24c] sm:$0xf]  ;;  %v4108_v62 = vld [vmem:[#allocation8 + $0x258] sm:$0xf0]  ;;  %v5177_v57 = vld [vmem:[#allocation10] sm:$0xf] }
 0x14d   :  { %v1686_v30 = vmax.f32 %v1590_v47, 0.0  ;;  %v4268_v50 = vld [vmem:[#allocation8 + $0x398] sm:$0xf0] }
 0x14e   :  { %2628 = vmatpush.bf16.msra.mxu3 %v3903_v59  ;;  %v4215_v59 = vor.u32 %v4744_v25, %v4212_v54  ;;  %v4314_v25 = vld [vmem:[#allocation8 + $0x3e8] sm:$0xf]  ;;  %v4771_v54 = vld [vmem:[#allocation8 + $0x3f4] sm:$0xf0] }
 0x14f   :  { %v5162_v61 = vpack.c.bf16 %v1686_v30, %v1686_v30  ;;  %v1604_v8 = vpop.f32.mrf.mxu2  ;;  %v4315_v58 = vor.u32 %v4771_v54, %v4314_v25  ;;  %v4252_v25 = vld [vmem:[#allocation8 + $0x378] sm:$0xf0] }
 0x150   :  { %2642 = vmatpush.bf16.msra.mxu1 %v4015_v39  ;;  %v1578_v3 = vpop.f32.mrf.mxu3  ;;  %2567 = vmatpush.bf16.msra.mxu0 %v4215_v59  ;;  %v4729_v59 = vld [vmem:[#allocation8 + $0x2ac] sm:$0xf]  ;;  %v4763_v8 = vld [vmem:[#allocation8 + $0x3b4] sm:$0xf0] }
 0x151   :  { %2504 = vmatmul.bf16.vlgmr.msrb.gmra.mxu2 %v5162_v61 }
 0x152   :  { %2629 = vmatpush.bf16.msra.mxu3 %v3887_v9  ;;  %v4199_v9 = vor.u32 %v4740_v4, %v4196_v5  ;;  %2600 = vmatpush.bf16.msrb.mxu2 %v4187_v60  ;;  %v4156_v60 = vld [vmem:[#allocation8 + $0x2b8] sm:$0xf0]  ;;  %v4299_v4 = vor.u32 %v4767_v0, %v4298_v63  ;;  %v4725_v5 = vld [vmem:[#allocation8 + $0x28c] sm:$0xf] }
 0x153   :  { %v4745_v0 = vld [vmem:[#allocation8 + $0x32c] sm:$0xf] }
 0x154   :  { %2643 = vmatpush.bf16.msra.mxu1 %v3999_v52  ;;  %2568 = vmatpush.bf16.msra.mxu0 %v4199_v9  ;;  %v4143_v9 = vor.u32 %v4725_v5, %v4140_v46  ;;  %v4204_v5 = vld [vmem:[#allocation8 + $0x318] sm:$0xf0] }
 0x156   :  { %2630 = vmatpush.bf16.msra.mxu3 %v3871_v18  ;;  %2601 = vmatpush.bf16.msrb.mxu2 %v4171_v11  ;;  %v331_v18 = vperm.slane %v5111_v2, 3  ;;  %v4283_v11 = vor.u32 %v4763_v8, %v4282_v37 }
 0x158   :  { %2644 = vmatpush.bf16.msra.mxu1 %v3983_v1  ;;  %v1603_v23 = vadd.f32 %v1602_v6, %v331_v18  ;;  %v4188_v6 = vld [vmem:[#allocation8 + $0x2f8] sm:$0xf0]  ;;  %v4159_v1 = vor.u32 %v4729_v59, %v4156_v60  ;;  %v4250_v18 = vld [vmem:[#allocation8 + $0x368] sm:$0xf] }
 0x15a   :  { %2631 = vmatpush.bf16.msra.mxu3 %v3855_v29  ;;  %2602 = vmatpush.bf16.msrb.mxu2 %v4155_v45  ;;  %v1616_v38 = vadd.f32 %v5159_v28, %v1603_v23  ;;  %v4090_v29 = vld [vmem:[#allocation8 + $0x228] sm:$0xf]  ;;  %v4092_v23 = vld [vmem:[#allocation8 + $0x238] sm:$0xf0] }
 0x15b   :  { %v4091_v42 = vor.u32 %v4715_v32, %v4090_v29  ;;  %v4218_v29 = vld [vmem:[#allocation8 + $0x328] sm:$0xf]  ;;  %v4747_v32 = vld [vmem:[#allocation8 + $0x334] sm:$0xf0] }
 0x15c   :  { %2645 = vmatpush.bf16.msra.mxu1 %v3967_v14  ;;  %v1628_v24 = vpop.f32.mrf.mxu1  ;;  %v4266_v14 = vld [vmem:[#allocation8 + $0x388] sm:$0xf] }
 0x15d   :  { %v1629_v33 = vadd.f32 %v1628_v24, %v1616_v38  ;;  %v4267_v45 = vor.u32 %v4759_v15, %v4266_v14  ;;  %v4234_v24 = vld [vmem:[#allocation8 + $0x348] sm:$0xf]  ;;  %v4779_v14 = vld [vmem:[#allocation11 + $0x38] sm:$0xff] }
 0x15e   :  { %2632 = vmatpush.bf16.msra.mxu3 %v3839_v48  ;;  %2603 = vmatpush.bf16.msrb.mxu2 %v4139_v20  ;;  %v4191_v48 = vor.u32 %v4737_v10, %v4188_v6  ;;  %v4111_v20 = vor.u32 %v4717_v17, %v4108_v62  ;;  %v4765_v10 = vld [vmem:[#allocation8 + $0x3cc] sm:$0xf]  ;;  %v4300_v6 = vld [vmem:[#allocation8 + $0x3d8] sm:$0xf0] }
 0x15f   :  { %v1667_v2 = vpop.f32.mrf.mxu0 }
 0x160   :  { %2646 = vmatpush.bf16.msra.mxu1 %v3951_v19  ;;  %v4755_v19 = vld [vmem:[#allocation8 + $0x374] sm:$0xf0] }
 0x161   :  { %2556 = vmatmul.bf16.vlgmr.msra.gmra.mxu2 %v5162_v61  ;;  %v4251_v21 = vor.u32 %v4755_v19, %v4250_v18  ;;  %v4777_v18 = vld [vmem:[#allocation11 + $0x28] sm:$0xff] }
 0x162   :  { %2633 = vmatpush.bf16.msra.mxu3 %v3823_v34  ;;  %2604 = vmatpush.bf16.msrb.mxu2 %v4123_v26  ;;  %v4751_v26 = vld [vmem:[#allocation8 + $0x354] sm:$0xf0] }
 0x163   :  { %2647 = vmatmul.bf16.vlgmr.msra.gmra.mxu1 %v5138_v7  ;;  %v4711_v7 = vld [vmem:[#allocation8 + $0x214] sm:$0xf0]  ;;  %v4235_v38 = vor.u32 %v4751_v26, %v4234_v24  ;;  %v4787_v24 = vld [vmem:[#allocation11 + $0x78] sm:$0xff] }
 0x164   :  { %v1630_v36 = vpop.f32.mrf.mxu1  ;;  %v4075_v47 = vor.u32 %v4711_v7, %v4074_v43  ;;  %v4316_v43 = vld [vmem:[#allocation8 + $0x3f8] sm:$0xf0]  ;;  %2959 = vmatpush.bf16.msrb.mxu1 %v4787_v24  ;;  %v4774_v26 = vld [vmem:[#allocation11 + $0x10] sm:$0xff] }
 0x165   :  { %2634 = vmatmul.bf16.vlgmr.msra.gmra.mxu3 %v5131_v51  ;;  %v4719_v51 = vld [vmem:[#allocation8 + $0x254] sm:$0xf0]  ;;  %v4219_v36 = vor.u32 %v4747_v32, %v4218_v29  ;;  %v1825_v32 = vperm.slane %v5177_v57, 3 }
 0x166   :  { %v4107_v31 = vor.u32 %v4719_v51, %v4106_v27  ;;  %v4095_v51 = vor.u32 %v4713_v22, %v4092_v23  ;;  %2946 = vmatpush.bf16.msrb.mxu3 %v4779_v14  ;;  %v4775_v23 = vld [vmem:[#allocation11 + $0x18] sm:$0xff]  ;;  %v4797_v14 = vld [vmem:[#allocation11 + $0xc8] sm:$0xff] }
 0x167   :  { %v1654_v41 = vpop.f32.mrf.mxu2  ;;  %v1669_v28 = vpop.f32.mrf.mxu0 }
 0x168   :  { %v1641_v39 = vpop.f32.mrf.mxu3  ;;  %2605 = vmatpush.bf16.msrb.mxu2 %v4107_v31  ;;  %v4076_v31 = vld [vmem:[#allocation8 + $0x218] sm:$0xf0]  ;;  %v4303_v28 = vor.u32 %v4765_v10, %v4300_v6  ;;  %v4781_v10 = vld [vmem:[#allocation11 + $0x48] sm:$0xff] }
 0x169   :  { %v1642_v40 = vadd.f32 %v1641_v39, %v1629_v33  ;;  %v4202_v39 = vld [vmem:[#allocation8 + $0x308] sm:$0xf]  ;;  %v4793_v6 = vld [vmem:[#allocation11 + $0xa8] sm:$0xff] }
 0x16b   :  { %v1655_v16 = vadd.f32 %v1654_v41, %v1642_v40  ;;  %v4743_v40 = vld [vmem:[#allocation8 + $0x314] sm:$0xf0] }
 0x16c   :  { %2606 = vmatpush.bf16.msrb.mxu2 %v4091_v42  ;;  %v1680_v49 = vpop.f32.mrf.mxu1  ;;  %v4769_v42 = vld [vmem:[#allocation8 + $0x3ec] sm:$0xf]  ;;  %v4203_v7 = vor.u32 %v4743_v40, %v4202_v39 }
 0x16d   :  { %v1668_v44 = vadd.f32 %v1667_v2, %v1655_v16  ;;  %v4709_v2 = vld [vmem:[#allocation8 + $0x20c] sm:$0xf]  ;;  %v4319_v16 = vor.u32 %v4769_v42, %v4316_v43  ;;  %v4794_v42 = vld [vmem:[#allocation11 + $0xb0] sm:$0xff] }
 0x16e   :  { %v4079_v33 = vor.u32 %v4709_v2, %v4076_v31  ;;  %v4772_v2 = vld [vmem:[#allocation11] sm:$0xff] }
 0x16f   :  { %v1681_v52 = vadd.f32 %v1680_v49, %v1668_v44  ;;  %v1656_v30 = vpop.f32.mrf.mxu2  ;;  %v4761_v44 = vld [vmem:[#allocation8 + $0x3ac] sm:$0xf]  ;;  %v4784_v31 = vld [vmem:[#allocation11 + $0x60] sm:$0xff] }
 0x170   :  { %v1643_v53 = vpop.f32.mrf.mxu3  ;;  %2607 = vmatpush.bf16.msrb.mxu2 %v4075_v47  ;;  %v4284_v47 = vld [vmem:[#allocation8 + $0x3b8] sm:$0xf0]  ;;  %v4757_v49 = vld [vmem:[#allocation8 + $0x38c] sm:$0xf] }
 0x171   :  { %v1687_v56 = vmax.f32 %v1681_v52, 0.0  ;;  %v4271_v52 = vor.u32 %v4757_v49, %v4268_v50  ;;  %v1822_v53 = vperm.slane %v5177_v57, 0  ;;  %v4791_v50 = vld [vmem:[#allocation11 + $0x98] sm:$0xff] }
 0x173   :  { %v5170_v34 = vpack.c.bf16 %v1687_v56, %v1687_v56  ;;  %2608 = vmatmul.bf16.vlgmr.msrb.gmra.mxu2 %v5162_v61  ;;  %v4749_v56 = vld [vmem:[#allocation8 + $0x34c] sm:$0xf] }
 0x174   :  { %2652 = vmatpush.bf16.msra.mxu2 %v4191_v48  ;;  %v1682_v3 = vpop.f32.mrf.mxu1  ;;  %v4287_v48 = vor.u32 %v4761_v44, %v4284_v47  ;;  %v4780_v44 = vld [vmem:[#allocation11 + $0x40] sm:$0xff] }
 0x175   :  { %2517 = vmatmul.bf16.vlgmr.msrb.gmra.mxu0 %v5170_v34  ;;  %v4792_v47 = vld [vmem:[#allocation11 + $0xa0] sm:$0xff] }
 0x176   :  { %2613 = vmatpush.bf16.msrb.mxu0 %v4315_v58 }
 0x178   :  { %2653 = vmatpush.bf16.msra.mxu2 %v4175_v35  ;;  %v4236_v35 = vld [vmem:[#allocation8 + $0x358] sm:$0xf0] }
 0x179   :  { %v4239_v63 = vor.u32 %v4749_v56, %v4236_v35  ;;  %v4788_v56 = vld [vmem:[#allocation11 + $0x80] sm:$0xff]  ;;  %v4803_v35 = vld [vmem:[#allocation11 + $0xf8] sm:$0xff] }
 0x17a   :  { %2614 = vmatpush.bf16.msrb.mxu0 %v4299_v4  ;;  %v4741_v4 = vld [vmem:[#allocation8 + $0x30c] sm:$0xf] }
 0x17b   :  { %v4207_v8 = vor.u32 %v4741_v4, %v4204_v5  ;;  %v4800_v4 = vld [vmem:[#allocation11 + $0xe0] sm:$0xff] }
 0x17c   :  { %2654 = vmatpush.bf16.msra.mxu2 %v4159_v1  ;;  %v4220_v1 = vld [vmem:[#allocation8 + $0x338] sm:$0xf0] }
 0x17d   :  { %v4223_v3 = vor.u32 %v4745_v0, %v4220_v1  ;;  %v4801_v1 = vld [vmem:[#allocation11 + $0xe8] sm:$0xff] }
 0x17e   :  { %2615 = vmatpush.bf16.msrb.mxu0 %v4283_v11 }
 0x180   :  { %2655 = vmatpush.bf16.msra.mxu2 %v4143_v9  ;;  %v1823_v9 = vperm.slane %v5177_v57, 1 }
 0x182   :  { %2616 = vmatpush.bf16.msrb.mxu0 %v4267_v45  ;;  %v4778_v45 = vld [vmem:[#allocation11 + $0x30] sm:$0xff] }
 0x183   :  { %2947 = vmatpush.bf16.msrb.mxu3 %v4778_v45 }
 0x184   :  { %2656 = vmatpush.bf16.msra.mxu2 %v4127_v55  ;;  %v1824_v55 = vperm.slane %v5177_v57, 2  ;;  %v4790_v57 = vld [vmem:[#allocation11 + $0x90] sm:$0xff] }
 0x185   :  { %2569 = vmatmul.bf16.vlgmr.msra.gmra.mxu0 %v5170_v34 }
 0x186   :  { %2617 = vmatpush.bf16.msrb.mxu0 %v4251_v21  ;;  %v4776_v21 = vld [vmem:[#allocation11 + $0x20] sm:$0xff] }
 0x187   :  { %2948 = vmatpush.bf16.msrb.mxu3 %v4777_v18 }
 0x188   :  { %v2479_v27 = vpop.f32.mrf.mxu3  ;;  %2657 = vmatpush.bf16.msra.mxu2 %v4111_v20 }
 0x189   :  { %v2480_v30 = vadd.f32 %v2479_v27, %v1822_v53  ;;  %v4786_v27 = vld [vmem:[#allocation11 + $0x70] sm:$0xff] }
 0x18a   :  { %2618 = vmatpush.bf16.msrb.mxu0 %v4235_v38  ;;  %2960 = vmatpush.bf16.msrb.mxu1 %v4786_v27  ;;  %v4785_v38 = vld [vmem:[#allocation11 + $0x68] sm:$0xff] }
 0x18b   :  { %2949 = vmatpush.bf16.msrb.mxu3 %v4776_v21 }
 0x18c   :  { %2658 = vmatpush.bf16.msra.mxu2 %v4095_v51  ;;  %v4773_v51 = vld [vmem:[#allocation11 + $0x8] sm:$0xff] }
 0x18e   :  { %2619 = vmatpush.bf16.msrb.mxu0 %v4219_v36  ;;  %2961 = vmatpush.bf16.msrb.mxu1 %v4785_v38  ;;  %v4795_v36 = vld [vmem:[#allocation11 + $0xb8] sm:$0xff] }
 0x18f   :  { %2950 = vmatpush.bf16.msrb.mxu3 %v4775_v23 }
 0x190   :  { %v2481_v41 = vpop.f32.mrf.mxu3  ;;  %2659 = vmatpush.bf16.msra.mxu2 %v4079_v33  ;;  %v4783_v33 = vld [vmem:[#allocation11 + $0x58] sm:$0xff] }
 0x191   :  { %v4782_v41 = vld [vmem:[#allocation11 + $0x50] sm:$0xff] }
 0x192   :  { %2620 = vmatpush.bf16.msrb.mxu0 %v4203_v7  ;;  %2962 = vmatpush.bf16.msrb.mxu1 %v4784_v31 }
 0x193   :  { %2660 = vmatmul.bf16.vlgmr.msra.gmra.mxu2 %v5162_v61  ;;  %v4753_v61 = vld [vmem:[#allocation8 + $0x36c] sm:$0xf]  ;;  %2951 = vmatpush.bf16.msrb.mxu3 %v4774_v26 }
 0x194   :  { %v4255_v54 = vor.u32 %v4753_v61, %v4252_v25  ;;  %2972 = vmatpush.bf16.msrb.mxu2 %v4795_v36  ;;  %v4789_v61 = vld [vmem:[#allocation11 + $0x88] sm:$0xff] }
 0x195   :  { %2621 = vmatmul.bf16.vlgmr.msrb.gmra.mxu0 %v5170_v34 }
 0x196   :  { %2665 = vmatpush.bf16.msra.mxu0 %v4319_v16  ;;  %2963 = vmatpush.bf16.msrb.mxu1 %v4783_v33 }
 0x197   :  { %2952 = vmatpush.bf16.msrb.mxu3 %v4773_v51 }
 0x198   :  { %v2492_v58 = vpop.f32.mrf.mxu1  ;;  %2973 = vmatpush.bf16.msrb.mxu2 %v4794_v42 }
 0x199   :  { %v5180_v60 = vadd.f32 %v2492_v58, %v2480_v30 }
 0x19a   :  { %2666 = vmatpush.bf16.msra.mxu0 %v4303_v28  ;;  %2964 = vmatpush.bf16.msrb.mxu1 %v4782_v41 }
 0x19b   :  { %2953 = vmatpush.bf16.msrb.mxu3 %v4772_v2 }
 0x19c   :  { %2974 = vmatpush.bf16.msrb.mxu2 %v4793_v6 }
 0x19e   :  { %2667 = vmatpush.bf16.msra.mxu0 %v4287_v48  ;;  %2965 = vmatpush.bf16.msrb.mxu1 %v4781_v10 }
 0x1a0   :  { %v2494_v46 = vpop.f32.mrf.mxu1  ;;  %2975 = vmatpush.bf16.msrb.mxu2 %v4792_v47 }
 0x1a2   :  { %2668 = vmatpush.bf16.msra.mxu0 %v4271_v52  ;;  %2966 = vmatpush.bf16.msrb.mxu1 %v4780_v44 }
 0x1a4   :  { %2976 = vmatpush.bf16.msrb.mxu2 %v4791_v50 }
 0x1a6   :  { %2669 = vmatpush.bf16.msra.mxu0 %v4255_v54 }
 0x1a8   :  { %v2531_v59 = vpop.f32.mrf.mxu3  ;;  %v2544_v12 = vpop.f32.mrf.mxu1  ;;  %2977 = vmatpush.bf16.msrb.mxu2 %v4790_v57 }
 0x1a9   :  { %v2532_v11 = vadd.f32 %v2531_v59, %v1823_v9 }
 0x1aa   :  { %2670 = vmatpush.bf16.msra.mxu0 %v4239_v63  ;;  %v4802_v63 = vld [vmem:[#allocation11 + $0xf0] sm:$0xff] }
 0x1ab   :  { %v5183_v13 = vadd.f32 %v2544_v12, %v2532_v11  ;;  %v4798_v11 = vld [vmem:[#allocation11 + $0xd0] sm:$0xff] }
 0x1ac   :  { %2978 = vmatpush.bf16.msrb.mxu2 %v4789_v61 }
 0x1ae   :  { %2671 = vmatpush.bf16.msra.mxu0 %v4223_v3 }
 0x1b0   :  { %v2533_v37 = vpop.f32.mrf.mxu3  ;;  %v2546_v15 = vpop.f32.mrf.mxu1  ;;  %2979 = vmatpush.bf16.msrb.mxu2 %v4788_v56 }
 0x1b1   :  { %v4799_v37 = vld [vmem:[#allocation11 + $0xd8] sm:$0xff] }
 0x1b2   :  { %2672 = vmatpush.bf16.msra.mxu0 %v4207_v8 }
 0x1b5   :  { %2673 = vmatmul.bf16.vlgmr.msra.gmra.mxu0 %v5170_v34 }
 0x1b6   :  { %2985 = vmatpush.bf16.msrb.mxu0 %v4803_v35 }
 0x1ba   :  { %2986 = vmatpush.bf16.msrb.mxu0 %v4802_v63 }
 0x1be   :  { %2987 = vmatpush.bf16.msrb.mxu0 %v4801_v1 }
 0x1c0   :  { %v2596_v19 = vpop.f32.mrf.mxu1 }
 0x1c2   :  { %2988 = vmatpush.bf16.msrb.mxu0 %v4800_v4 }
 0x1c6   :  { %2989 = vmatpush.bf16.msrb.mxu0 %v4799_v37 }
 0x1c8   :  { %v2583_v17 = vpop.f32.mrf.mxu3  ;;  %v2598_v34 = vpop.f32.mrf.mxu1 }
 0x1c9   :  { %v2584_v62 = vadd.f32 %v2583_v17, %v1824_v55  ;;  %v4796_v55 = vld [vmem:[#allocation11 + $0xc0] sm:$0xff] }
 0x1ca   :  { %2990 = vmatpush.bf16.msrb.mxu0 %v4798_v11 }
 0x1cb   :  { %v5187_v20 = vadd.f32 %v2596_v19, %v2584_v62 }
 0x1ce   :  { %2991 = vmatpush.bf16.msrb.mxu0 %v4797_v14 }
 0x1d0   :  { %v2585_v22 = vpop.f32.mrf.mxu3 }
 0x1d2   :  { %2992 = vmatpush.bf16.msrb.mxu0 %v4796_v55 }
 0x1d4   :  { %v2505_v29 = vpop.f32.mrf.mxu2 }
 0x1d5   :  { %v2506_v53 = vadd.f32 %v2505_v29, %v5180_v60 }
 0x1dc   :  { %v2507_v7 = vpop.f32.mrf.mxu2 }
 0x1e0   :  { %v2648_v43 = vpop.f32.mrf.mxu1 }
 0x1e4   :  { %v2557_v49 = vpop.f32.mrf.mxu2 }
 0x1e5   :  { %v2558_v60 = vadd.f32 %v2557_v49, %v5183_v13 }
 0x1e8   :  { %v2635_v39 = vpop.f32.mrf.mxu3  ;;  %v2650_v48 = vpop.f32.mrf.mxu1 }
 0x1e9   :  { %v2636_v40 = vadd.f32 %v2635_v39, %v1825_v32  ;;  %v4815_v32 = vld [vmem:[%s5208_s6] ss:$0 sm:$0xff] }
 0x1eb   :  { %v5190_v16 = vadd.f32 %v2648_v43, %v2636_v40 }
 0x1ec   :  { %v2559_v52 = vpop.f32.mrf.mxu2 }
 0x1f0   :  { %v2637_v28 = vpop.f32.mrf.mxu3 }
 0x1f2   :  { %v2518_v25 = vpop.f32.mrf.mxu0 }
 0x1f3   :  { %v2519_v54 = vadd.f32 %v2518_v25, %v2506_v53 }
 0x1f5   :  { %v2678_v30 = vmax.f32 %v2519_v54, 0.0 }
 0x1f6   :  { %v2609_v58 = vpop.f32.mrf.mxu2 }
 0x1f7   :  { %v2682_v59 = vpack.c.bf16 %v2678_v30, %v2678_v30  ;;  %v2610_v15 = vadd.f32 %v2609_v58, %v5187_v20 }
 0x1f9   :  { %2954 = vmatmul.bf16.vlgmr.msrb.gmra.mxu3 %v2682_v59 }
 0x1fa   :  { %v2520_v0 = vpop.f32.mrf.mxu0 }
 0x1fe   :  { %v2611_v3 = vpop.f32.mrf.mxu2 }
 0x202   :  { %v2570_v5 = vpop.f32.mrf.mxu0 }
 0x203   :  { %v2571_v46 = vadd.f32 %v2570_v5, %v2558_v60 }
 0x205   :  { %v2679_v8 = vmax.f32 %v2571_v46, 0.0 }
 0x207   :  { %v2683_v9 = vpack.c.bf16 %v2679_v8, %v2679_v8 }
 0x209   :  { %2967 = vmatmul.bf16.vlgmr.msrb.gmra.mxu1 %v2683_v9 }
 0x20a   :  { %v2572_v12 = vpop.f32.mrf.mxu0 }
 0x212   :  { %v2622_v45 = vpop.f32.mrf.mxu0 }
 0x213   :  { %v2623_v17 = vadd.f32 %v2622_v45, %v2610_v15 }
 0x215   :  { %v2680_v13 = vmax.f32 %v2623_v17, 0.0 }
 0x216   :  { %v2661_v62 = vpop.f32.mrf.mxu2 }
 0x217   :  { %v2684_v18 = vpack.c.bf16 %v2680_v13, %v2680_v13  ;;  %v2662_v22 = vadd.f32 %v2661_v62, %v5190_v16 }
 0x219   :  { %2980 = vmatmul.bf16.vlgmr.msrb.gmra.mxu2 %v2684_v18 }
 0x21a   :  { %v2624_v19 = vpop.f32.mrf.mxu0 }
 0x21e   :  { %v2663_v21 = vpop.f32.mrf.mxu2 }
 0x232   :  { %v2674_v23 = vpop.f32.mrf.mxu0 }
 0x233   :  { %v2675_v24 = vadd.f32 %v2674_v23, %v2662_v22 }
 0x235   :  { %v2681_v34 = vmax.f32 %v2675_v24, 0.0 }
 0x237   :  { %v2685_v26 = vpack.c.bf16 %v2681_v34, %v2681_v34 }
 0x239   :  { %2993 = vmatmul.bf16.vlgmr.msrb.gmra.mxu0 %v2685_v26 }
 0x23a   :  { %v2676_v27 = vpop.f32.mrf.mxu0 }
 0x27c   :  { %v2955_v51 = vpop.f32.mrf.mxu3 }
 0x27d   :  { %v2956_v33 = vadd.f32 %v4815_v32, %v2955_v51 }
 0x284   :  { %v2957_v20 = vpop.f32.mrf.mxu3 }
 0x286   :  { %v2968_v38 = vpop.f32.mrf.mxu1 }
 0x287   :  { %v2969_v36 = vadd.f32 %v2968_v38, %v2956_v33 }
 0x28e   :  { %v2970_v2 = vpop.f32.mrf.mxu1 }
 0x29c   :  { %v2981_v31 = vpop.f32.mrf.mxu2 }
 0x29d   :  { %v2982_v39 = vadd.f32 %v2981_v31, %v2969_v36 }
 0x2a4   :  { %v2983_v29 = vpop.f32.mrf.mxu2 }
 0x2b6   :  { %v2994_v40 = vpop.f32.mrf.mxu0 }
 0x2b7   :  { %v2995_v41 = vadd.f32 %v2994_v40, %v2982_v39 }
 0x2b9   :  { %v2998_v42 = vpack.c.bf16 %v2995_v41, %v2995_v41 }
 0x2bb   :  { %2999 = vst [vmem:[#allocation13] sm:$0xf] %v2998_v42 }
 0x2bc   :  { %3010 = dma.vmem_to_hbm [thread:$0]  %s3006_s9, 64, %s3008_s12, [#allocation4]  }
 0x2be   :  { %v2996_v43 = vpop.f32.mrf.mxu0 }
 0x2bf   :  { %4992 = dma.done.wait [#allocation4], 64  }
 0x2c0   :  { %4993 = vsyncadd [#allocation4], 4294967232 }
 0x2c1   :  { %3015 = vsyncpa [#allocation3], 1 }
 0x2c2   :  { %3016 = vsyncpa [#allocation6], 1 }
 0x2c3   :  { %3017 = vsyncpa [#allocation9], 1 }
 0x2c4   :  { %3018 = vsyncpa [#allocation12], 1 }
 0x2c5   :  { %3019 = vsyncpa [#allocation4], 1 }

</bundles_post_ra>
